<compile_context>
chip_gen: v7x
topology: tpu7x:2x2x1
jax: 0.10.0
libtpu: 0.0.40
codegen_flags: <defaults>
</compile_context>

<pallas_src>
import functools

import jax
import jax.numpy as jnp
from jax import lax
from jax.experimental import pallas as pl
from jax.experimental.pallas import tpu as pltpu


def crf_kernel(em_ref, mask_ref, lab_ref, trans_ref, out_ref,
               alpha_ref, ohct_ref, score_ref, *, num_tags, seq_chunk):
    """One (batch-tile, seq-chunk) grid step of the fused CRF forward.

    Layout (batch on lanes, tags on sublanes):
      em_ref    : (SC, T, TB)  emissions chunk (any float dtype)
      mask_ref  : (SC, TB)     int32
      lab_ref   : (SC, TB)     int32
      trans_ref : (T2, T2)     float32  rows = from-tag, cols = to-tag
      out_ref   : (1, TB)      float32  gold_score - forward_score
      alpha_ref / ohct_ref : (T2, TB) f32   carried recursion state
      score_ref : (1, TB) f32               carried gold score
    """
    T = num_tags
    T2 = T + 2
    start_tag = T
    end_tag = T + 1
    SC = seq_chunk
    NEG = jnp.float32(-10000.0)
    TB = out_ref.shape[1]

    s_idx = pl.program_id(1)
    ns = pl.num_programs(1)

    # ---- tiny (T2,T2) precompute, once per grid step ----
    trans = trans_ref[...].astype(jnp.float32)           # (T2, T2) [from, to]
    trans_t = trans.T                                     # (T2, T2) [to, from]
    t_colmax = jnp.max(trans_t, axis=1, keepdims=True)    # (T2, 1): max over 'from'
    # exp_t[k, j] = exp(trans[j, k] - max_j trans[j, k])  (<= 1, no overflow)
    exp_t = jnp.exp(trans_t - t_colmax)                   # (T2, T2)

    row = lax.broadcasted_iota(jnp.int32, (T2, TB), 0)    # tag index on sublanes
    neg_pad = jnp.full((2, TB), NEG, jnp.float32)         # hoisted out of loop

    # ---- init carried state at the first sequence chunk ----
    @pl.when(s_idx == 0)
    def _():
        alpha_ref[...] = jnp.where(row == start_tag, jnp.float32(0.0), NEG)
        ohct_ref[...] = (row == start_tag).astype(jnp.float32)
        score_ref[...] = jnp.zeros_like(score_ref)

    # ---- fused serial recursion over this chunk ----
    def step(i, carry):
        score, oh_ct, alpha = carry

        e_i = em_ref[pl.ds(i, 1), :, :][0].astype(jnp.float32)      # (T, TB)
        e_pad = jnp.concatenate([e_i, neg_pad], axis=0)             # (T2, TB)
        cl = jnp.clip(lab_ref[pl.ds(i, 1), :], 0, T - 1)            # (1, TB)
        keep = mask_ref[pl.ds(i, 1), :] != 0                        # (1, TB)
        m_f = keep.astype(jnp.float32)                              # (1, TB)
        oh_cl = (row == cl).astype(jnp.float32)                     # (T2, TB)

        # Gold path: emissions[label] + transitions[prev_tag, label].
        emit_s = jnp.sum(e_pad * oh_cl, axis=0, keepdims=True)      # (1, TB)
        q = jnp.dot(trans_t, oh_ct,
                    preferred_element_type=jnp.float32)             # q[k,b]=trans[prev_b,k]
        trans_s = jnp.sum(q * oh_cl, axis=0, keepdims=True)         # (1, TB)
        score = score + (emit_s + trans_s) * m_f
        oh_ct = jnp.where(keep, oh_cl, oh_ct)

        # Forward path: matmul-form logsumexp over from-tags (the emission
        # term is constant over the reduced axis, so it is added afterwards).
        a_mx = jnp.max(alpha, axis=0, keepdims=True)                # (1, TB)
        p = jnp.exp(alpha - a_mx)                                   # (T2, TB) <= 1
        den = jnp.dot(exp_t, p,
                      preferred_element_type=jnp.float32)           # (T2, TB)
        lse = a_mx + t_colmax + jnp.log(den)                        # (T2, TB)
        alpha = jnp.where(keep, lse + e_pad, alpha)
        return score, oh_ct, alpha

    carry0 = (score_ref[...], ohct_ref[...], alpha_ref[...])
    unroll = True if SC <= 16 else 8
    score, oh_ct, alpha = lax.fori_loop(0, SC, step, carry0, unroll=unroll)

    score_ref[...] = score
    ohct_ref[...] = oh_ct
    alpha_ref[...] = alpha

    # ---- finalize on the last sequence chunk ----
    @pl.when(s_idx == ns - 1)
    def _():
        te = trans[:, end_tag:end_tag + 1]                          # (T2, 1)
        gold = score + jnp.sum(oh_ct * te, axis=0, keepdims=True)   # (1, TB)
        alpha_f = alpha + te                                        # (T2, TB)
        mx = jnp.max(alpha_f, axis=0, keepdims=True)
        fwd = mx + jnp.log(jnp.sum(jnp.exp(alpha_f - mx), axis=0,
                                   keepdims=True))
        out_ref[...] = gold - fwd


def _pick_batch_tile(B):
    """Lane-dim batch tile: a multiple of 128, or the full batch."""
    if B % 128 == 0:
        for tb in (512, 256, 128):
            if B % tb == 0:
                return tb
    return B


def _pick_seq_chunk(S, TB, T, itemsize, budget=8 << 20):
    """Largest seq chunk (divisor of S; multiple of 8 or == S) whose
    double-buffered emissions block fits the VMEM budget."""
    cands = {S}
    for c in range(8, S, 8):
        if S % c == 0:
            cands.add(c)
    for c in sorted(cands, reverse=True):
        if 2 * TB * c * T * itemsize <= budget:
            return c
    return min(cands)


def crf_forward(emissions, masks, labels, transitions):
    """CRF.forward: gold_score - forward_score, shape (B,) float32."""
    B, S, T = emissions.shape
    T2 = T + 2
    assert transitions.shape == (T2, T2)

    # Batch-on-lanes layout: (S, T, B) / (S, B).  One XLA transpose pass; the
    # serial in-kernel recursion then runs lane-dense even for tiny tag counts.
    em_t = jnp.transpose(emissions, (1, 2, 0))
    mask_t = jnp.transpose(masks.astype(jnp.int32), (1, 0))
    lab_t = jnp.transpose(labels.astype(jnp.int32), (1, 0))

    TB = _pick_batch_tile(B)
    SC = _pick_seq_chunk(S, TB, T, em_t.dtype.itemsize)
    nb, ns = B // TB, S // SC

    est_vmem = (2 * TB * SC * T * em_t.dtype.itemsize    # emissions (dbl-buffered)
                + 4 * TB * SC * 4                         # masks + labels
                + 2 * T2 * T2 * 4                         # transitions
                + (2 * T2 + 2) * TB * 4)                  # scratch + out
    vmem_limit = int(min(96 << 20, max(2 * est_vmem, 16 << 20)))

    out = pl.pallas_call(
        functools.partial(crf_kernel, num_tags=T, seq_chunk=SC),
        out_shape=jax.ShapeDtypeStruct((1, B), jnp.float32),
        grid=(nb, ns),
        in_specs=[
            pl.BlockSpec((SC, T, TB), lambda b, s: (s, 0, b)),
            pl.BlockSpec((SC, TB), lambda b, s: (s, b)),
            pl.BlockSpec((SC, TB), lambda b, s: (s, b)),
            pl.BlockSpec((T2, T2), lambda b, s: (0, 0)),
        ],
        out_specs=pl.BlockSpec((1, TB), lambda b, s: (0, b)),
        scratch_shapes=[
            pltpu.VMEM((T2, TB), jnp.float32),   # alpha (forward recursion)
            pltpu.VMEM((T2, TB), jnp.float32),   # one-hot previous gold tag
            pltpu.VMEM((1, TB), jnp.float32),    # gold score accumulator
        ],
        compiler_params=pltpu.CompilerParams(
            dimension_semantics=("parallel", "arbitrary"),
            vmem_limit_bytes=vmem_limit),
    )(em_t, mask_t, lab_t, transitions.astype(jnp.float32))
    return out[0]


def crf_forward_ref(emissions, masks, labels, transitions):
    """Pure-JAX reference mirroring the torch module exactly."""
    B, S, T = emissions.shape
    start_tag, end_tag = T, T + 1
    NEG = -10000.0
    emissions = emissions.astype(jnp.float32)

    score = jnp.zeros((B,), jnp.float32)
    current_tags = jnp.full((B,), start_tag, jnp.int32)
    for i in range(S):
        m = masks[:, i]
        cl = jnp.clip(labels[:, i], 0, T - 1)
        emit = jnp.take_along_axis(emissions[:, i], cl[:, None], axis=1)[:, 0]
        trans_s = transitions[current_tags, cl]
        score = score + (emit + trans_s) * m.astype(jnp.float32)
        current_tags = jnp.where(m != 0, cl, current_tags)
    score = score + transitions[current_tags, end_tag]

    alpha = jnp.full((B, T + 2), NEG, jnp.float32).at[:, start_tag].set(0.0)
    for i in range(S):
        m = masks[:, i][:, None]
        emit = jnp.concatenate(
            [emissions[:, i], jnp.full((B, 2), NEG, jnp.float32)], axis=1)
        s3 = alpha[:, :, None] + transitions[None, :, :] + emit[:, None, :]
        alpha_t = jax.nn.logsumexp(s3, axis=1)
        alpha = jnp.where(m != 0, alpha_t, alpha)
    alpha = alpha + transitions[:, end_tag][None, :]
    fwd = jax.nn.logsumexp(alpha, axis=1)
    return score - fwd


if __name__ == "__main__":
    B, S, T = 8, 8, 6            # batch, seq_len, num_tags
    T2 = T + 2
    start_tag, end_tag = T, T + 1

    key = jax.random.PRNGKey(0)
    k_e, k_l, k_t = jax.random.split(key, 3)

    emissions = jax.random.normal(k_e, (B, S, T), dtype=jnp.float32)
    labels = jax.random.randint(k_l, (B, S), 0, T, dtype=jnp.int32)

    lengths = jnp.array([8, 6, 5, 8, 3, 7, 8, 1], dtype=jnp.int32)
    masks = (jnp.arange(S)[None, :] < lengths[:, None]).astype(jnp.int32)
    masks = masks.at[3, 2].set(0)   # non-monotone mask exercises the tag carry

    # transitions parameter: randn + init_transitions()
    transitions = jax.random.normal(k_t, (T2, T2), dtype=jnp.float32)
    transitions = transitions.at[end_tag, :].set(-10000.0)
    transitions = transitions.at[:, start_tag].set(-10000.0)
    transitions = transitions.at[end_tag, start_tag].set(-10000.0)
    transitions = transitions.at[start_tag, end_tag].set(-10000.0)

    out = jax.block_until_ready(
        crf_forward(emissions, masks, labels, transitions))
    ref = crf_forward_ref(emissions, masks, labels, transitions)

    assert out.shape == (B,)
    assert jnp.allclose(out, ref, atol=1e-3, rtol=1e-4), (out, ref)
    print("KERNEL_OK")
</pallas_src>

<mosaic_0001>
module attributes {stable_mosaic.version = 11 : i64} {
  func.func @crf_kernel(%arg0: i32, %arg1: i32, %arg2: memref<8x6x8xf32, #tpu.memory_space<vmem>>, %arg3: memref<8x8xi32, #tpu.memory_space<vmem>>, %arg4: memref<8x8xi32, #tpu.memory_space<vmem>>, %arg5: memref<8x8xf32, #tpu.memory_space<vmem>>, %arg6: memref<1x8xf32, #tpu.memory_space<vmem>>, %arg7: memref<8x8xf32, #tpu.memory_space<vmem>>, %arg8: memref<8x8xf32, #tpu.memory_space<vmem>>, %arg9: memref<1x8xf32, #tpu.memory_space<vmem>>) attributes {dimension_semantics = [#tpu.dimension_semantics<parallel>, #tpu.dimension_semantics<arbitrary>], iteration_bounds = array<i64: 1, 1>, scalar_prefetch = 0 : i64, scratch_operands = 3 : i64, tpu.core_type = #tpu.core_type<tc>, window_params = [{transform_indices = @transform_0, window_bounds = array<i64: 8, 6, 8>}, {transform_indices = @transform_1, window_bounds = array<i64: 8, 8>}, {transform_indices = @transform_2, window_bounds = array<i64: 8, 8>}, {pipeline_mode = #tpu.pipeline_mode<synchronous>, transform_indices = @transform_3, window_bounds = array<i64: 8, 8>}, {transform_indices = @transform_4, window_bounds = array<i64: 1, 8>}]} {
    %c0 = arith.constant 0 : index
    %c0_0 = arith.constant 0 : index
    %0 = vector.load %arg5[%c0, %c0_0] : memref<8x8xf32, #tpu.memory_space<vmem>>, vector<8x8xf32>
    %1 = tpu.transpose %0, [1, 0] : vector<8x8xf32> -> vector<8x8xf32>
    %cst = arith.constant dense<0xFF800000> : vector<8xf32>
    %2 = vector.multi_reduction <maximumf>, %1, %cst [1] : vector<8x8xf32> to vector<8xf32>
    %3 = vector.shape_cast %2 : vector<8xf32> to vector<8x1xf32>
    %4 = vector.broadcast %3 : vector<8x1xf32> to vector<8x8xf32>
    %5 = arith.subf %1, %4 : vector<8x8xf32>
    %6 = math.exp %5 : vector<8x8xf32>
    %7 = tpu.iota {dimensions = array<i32: 0>} : vector<8x8xi32>
    %cst_1 = arith.constant -1.000000e+04 : f32
    %8 = vector.broadcast %cst_1 : f32 to vector<2x8xf32>
    %c0_i32 = arith.constant 0 : i32
    %9 = arith.cmpi eq, %arg1, %c0_i32 : i32
    %10 = arith.extui %9 : i1 to i32
    %cst_2 = arith.constant -1.000000e+04 : f32
    %c0_i32_3 = arith.constant 0 : i32
    %11 = arith.cmpi ne, %10, %c0_i32_3 : i32
    scf.if %11 {
      %c6_i32_115 = arith.constant 6 : i32
      %405 = vector.broadcast %c6_i32_115 : i32 to vector<8x8xi32>
      %406 = arith.cmpi eq, %7, %405 : vector<8x8xi32>
      %cst_116 = arith.constant 0.000000e+00 : f32
      %407 = vector.broadcast %cst_116 : f32 to vector<8x8xf32>
      %408 = vector.broadcast %cst_2 : f32 to vector<8x8xf32>
      %409 = arith.select %406, %407, %408 : vector<8x8xi1>, vector<8x8xf32>
      %c0_117 = arith.constant 0 : index
      %c0_118 = arith.constant 0 : index
      %410 = vector.load %arg7[%c0_117, %c0_118] : memref<8x8xf32, #tpu.memory_space<vmem>>, vector<8x8xf32>
      tpu.vector_store %arg7[%c0_117, %c0_118], %409 {strides = array<i32>} : memref<8x8xf32, #tpu.memory_space<vmem>>, vector<8x8xf32>,
      %c6_i32_119 = arith.constant 6 : i32
      %411 = vector.broadcast %c6_i32_119 : i32 to vector<8x8xi32>
      %412 = arith.cmpi eq, %7, %411 : vector<8x8xi32>
      %413 = arith.extui %412 : vector<8x8xi1> to vector<8x8xi32>
      %414 = arith.sitofp %413 : vector<8x8xi32> to vector<8x8xf32>
      %c0_120 = arith.constant 0 : index
      %c0_121 = arith.constant 0 : index
      %415 = vector.load %arg8[%c0_120, %c0_121] : memref<8x8xf32, #tpu.memory_space<vmem>>, vector<8x8xf32>
      tpu.vector_store %arg8[%c0_120, %c0_121], %414 {strides = array<i32>} : memref<8x8xf32, #tpu.memory_space<vmem>>, vector<8x8xf32>,
      %cst_122 = arith.constant 0.000000e+00 : f32
      %416 = vector.broadcast %cst_122 : f32 to vector<1x8xf32>
      %c0_123 = arith.constant 0 : index
      %c0_124 = arith.constant 0 : index
      %417 = vector.load %arg9[%c0_123, %c0_124] : memref<1x8xf32, #tpu.memory_space<vmem>>, vector<1x8xf32>
      tpu.vector_store %arg9[%c0_123, %c0_124], %416 {strides = array<i32>} : memref<1x8xf32, #tpu.memory_space<vmem>>, vector<1x8xf32>,
    } else {
    }
    %c0_4 = arith.constant 0 : index
    %c0_5 = arith.constant 0 : index
    %12 = vector.load %arg9[%c0_4, %c0_5] : memref<1x8xf32, #tpu.memory_space<vmem>>, vector<1x8xf32>
    %c0_6 = arith.constant 0 : index
    %c0_7 = arith.constant 0 : index
    %13 = vector.load %arg8[%c0_6, %c0_7] : memref<8x8xf32, #tpu.memory_space<vmem>>, vector<8x8xf32>
    %c0_8 = arith.constant 0 : index
    %c0_9 = arith.constant 0 : index
    %14 = vector.load %arg7[%c0_8, %c0_9] : memref<8x8xf32, #tpu.memory_space<vmem>>, vector<8x8xf32>
    %c0_i32_10 = arith.constant 0 : i32
    %15 = arith.index_cast %c0_i32_10 : i32 to index
    %c0_11 = arith.constant 0 : index
    %c0_12 = arith.constant 0 : index
    %16 = vector.load %arg2[%15, %c0_11, %c0_12] : memref<8x6x8xf32, #tpu.memory_space<vmem>>, vector<1x6x8xf32>
    %17 = vector.shape_cast %16 : vector<1x6x8xf32> to vector<6x8xf32>
    %18 = tpu.concatenate %17, %8 in 0 : vector<6x8xf32>, vector<2x8xf32> -> vector<8x8xf32>
    %19 = arith.index_cast %c0_i32_10 : i32 to index
    %c0_13 = arith.constant 0 : index
    %20 = vector.load %arg4[%19, %c0_13] : memref<8x8xi32, #tpu.memory_space<vmem>>, vector<1x8xi32>
    %c0_i32_14 = arith.constant 0 : i32
    %c5_i32 = arith.constant 5 : i32
    %21 = vector.broadcast %c0_i32_14 : i32 to vector<1x8xi32>
    %22 = arith.maxsi %21, %20 : vector<1x8xi32>
    %23 = vector.broadcast %c5_i32 : i32 to vector<1x8xi32>
    %24 = arith.minsi %23, %22 : vector<1x8xi32>
    %25 = arith.index_cast %c0_i32_10 : i32 to index
    %c0_15 = arith.constant 0 : index
    %26 = vector.load %arg3[%25, %c0_15] : memref<8x8xi32, #tpu.memory_space<vmem>>, vector<1x8xi32>
    %c0_i32_16 = arith.constant 0 : i32
    %27 = vector.broadcast %c0_i32_16 : i32 to vector<1x8xi32>
    %28 = arith.cmpi ne, %26, %27 : vector<1x8xi32>
    %29 = arith.extui %28 : vector<1x8xi1> to vector<1x8xi32>
    %30 = arith.sitofp %29 : vector<1x8xi32> to vector<1x8xf32>
    %31 = vector.broadcast %24 : vector<1x8xi32> to vector<8x8xi32>
    %32 = arith.cmpi eq, %7, %31 : vector<8x8xi32>
    %33 = arith.extui %32 : vector<8x8xi1> to vector<8x8xi32>
    %34 = arith.sitofp %33 : vector<8x8xi32> to vector<8x8xf32>
    %35 = arith.mulf %18, %34 : vector<8x8xf32>
    %cst_17 = arith.constant dense<0.000000e+00> : vector<8xf32>
    %36 = vector.multi_reduction <add>, %35, %cst_17 [0] : vector<8x8xf32> to vector<8xf32>
    %37 = vector.shape_cast %36 : vector<8xf32> to vector<1x8xf32>
    %cst_18 = arith.constant dense<0.000000e+00> : vector<8x8xf32>
    %38 = tpu.matmul %1, %13, %cst_18 {dimension_numbers = #tpu.dot_dimension_numbers<[1], [0], [0], [1], [0, 0, 1, 1], [], []>} : vector<8x8xf32>, vector<8x8xf32>, vector<8x8xf32> -> vector<8x8xf32>
    %39 = arith.mulf %38, %34 : vector<8x8xf32>
    %cst_19 = arith.constant dense<0.000000e+00> : vector<8xf32>
    %40 = vector.multi_reduction <add>, %39, %cst_19 [0] : vector<8x8xf32> to vector<8xf32>
    %41 = vector.shape_cast %40 : vector<8xf32> to vector<1x8xf32>
    %42 = arith.addf %37, %41 : vector<1x8xf32>
    %43 = arith.mulf %42, %30 : vector<1x8xf32>
    %44 = arith.addf %12, %43 : vector<1x8xf32>
    %45 = vector.shape_cast %28 : vector<1x8xi1> to vector<1x8xi1>
    %46 = vector.broadcast %45 : vector<1x8xi1> to vector<8x8xi1>
    %47 = arith.select %46, %34, %13 : vector<8x8xi1>, vector<8x8xf32>
    %cst_20 = arith.constant dense<0xFF800000> : vector<8xf32>
    %48 = vector.multi_reduction <maximumf>, %14, %cst_20 [0] : vector<8x8xf32> to vector<8xf32>
    %49 = vector.shape_cast %48 : vector<8xf32> to vector<1x8xf32>
    %50 = vector.broadcast %49 : vector<1x8xf32> to vector<8x8xf32>
    %51 = arith.subf %14, %50 : vector<8x8xf32>
    %52 = math.exp %51 : vector<8x8xf32>
    %cst_21 = arith.constant dense<0.000000e+00> : vector<8x8xf32>
    %53 = tpu.matmul %6, %52, %cst_21 {dimension_numbers = #tpu.dot_dimension_numbers<[1], [0], [0], [1], [0, 0, 1, 1], [], []>} : vector<8x8xf32>, vector<8x8xf32>, vector<8x8xf32> -> vector<8x8xf32>
    %54 = vector.broadcast %49 : vector<1x8xf32> to vector<8x8xf32>
    %55 = vector.broadcast %3 : vector<8x1xf32> to vector<8x8xf32>
    %56 = arith.addf %54, %55 : vector<8x8xf32>
    %57 = math.log %53 : vector<8x8xf32>
    %58 = arith.addf %56, %57 : vector<8x8xf32>
    %59 = arith.addf %58, %18 : vector<8x8xf32>
    %60 = vector.shape_cast %28 : vector<1x8xi1> to vector<1x8xi1>
    %61 = vector.broadcast %60 : vector<1x8xi1> to vector<8x8xi1>
    %62 = arith.select %61, %59, %14 : vector<8x8xi1>, vector<8x8xf32>
    %c1_i32 = arith.constant 1 : i32
    %63 = arith.index_cast %c1_i32 : i32 to index
    %c0_22 = arith.constant 0 : index
    %c0_23 = arith.constant 0 : index
    %64 = vector.load %arg2[%63, %c0_22, %c0_23] : memref<8x6x8xf32, #tpu.memory_space<vmem>>, vector<1x6x8xf32>
    %65 = vector.shape_cast %64 : vector<1x6x8xf32> to vector<6x8xf32>
    %66 = tpu.concatenate %65, %8 in 0 : vector<6x8xf32>, vector<2x8xf32> -> vector<8x8xf32>
    %67 = arith.index_cast %c1_i32 : i32 to index
    %c0_24 = arith.constant 0 : index
    %68 = vector.load %arg4[%67, %c0_24] : memref<8x8xi32, #tpu.memory_space<vmem>>, vector<1x8xi32>
    %c0_i32_25 = arith.constant 0 : i32
    %c5_i32_26 = arith.constant 5 : i32
    %69 = vector.broadcast %c0_i32_25 : i32 to vector<1x8xi32>
    %70 = arith.maxsi %69, %68 : vector<1x8xi32>
    %71 = vector.broadcast %c5_i32_26 : i32 to vector<1x8xi32>
    %72 = arith.minsi %71, %70 : vector<1x8xi32>
    %73 = arith.index_cast %c1_i32 : i32 to index
    %c0_27 = arith.constant 0 : index
    %74 = vector.load %arg3[%73, %c0_27] : memref<8x8xi32, #tpu.memory_space<vmem>>, vector<1x8xi32>
    %c0_i32_28 = arith.constant 0 : i32
    %75 = vector.broadcast %c0_i32_28 : i32 to vector<1x8xi32>
    %76 = arith.cmpi ne, %74, %75 : vector<1x8xi32>
    %77 = arith.extui %76 : vector<1x8xi1> to vector<1x8xi32>
    %78 = arith.sitofp %77 : vector<1x8xi32> to vector<1x8xf32>
    %79 = vector.broadcast %72 : vector<1x8xi32> to vector<8x8xi32>
    %80 = arith.cmpi eq, %7, %79 : vector<8x8xi32>
    %81 = arith.extui %80 : vector<8x8xi1> to vector<8x8xi32>
    %82 = arith.sitofp %81 : vector<8x8xi32> to vector<8x8xf32>
    %83 = arith.mulf %66, %82 : vector<8x8xf32>
    %cst_29 = arith.constant dense<0.000000e+00> : vector<8xf32>
    %84 = vector.multi_reduction <add>, %83, %cst_29 [0] : vector<8x8xf32> to vector<8xf32>
    %85 = vector.shape_cast %84 : vector<8xf32> to vector<1x8xf32>
    %cst_30 = arith.constant dense<0.000000e+00> : vector<8x8xf32>
    %86 = tpu.matmul %1, %47, %cst_30 {dimension_numbers = #tpu.dot_dimension_numbers<[1], [0], [0], [1], [0, 0, 1, 1], [], []>} : vector<8x8xf32>, vector<8x8xf32>, vector<8x8xf32> -> vector<8x8xf32>
    %87 = arith.mulf %86, %82 : vector<8x8xf32>
    %cst_31 = arith.constant dense<0.000000e+00> : vector<8xf32>
    %88 = vector.multi_reduction <add>, %87, %cst_31 [0] : vector<8x8xf32> to vector<8xf32>
    %89 = vector.shape_cast %88 : vector<8xf32> to vector<1x8xf32>
    %90 = arith.addf %85, %89 : vector<1x8xf32>
    %91 = arith.mulf %90, %78 : vector<1x8xf32>
    %92 = arith.addf %44, %91 : vector<1x8xf32>
    %93 = vector.shape_cast %76 : vector<1x8xi1> to vector<1x8xi1>
    %94 = vector.broadcast %93 : vector<1x8xi1> to vector<8x8xi1>
    %95 = arith.select %94, %82, %47 : vector<8x8xi1>, vector<8x8xf32>
    %cst_32 = arith.constant dense<0xFF800000> : vector<8xf32>
    %96 = vector.multi_reduction <maximumf>, %62, %cst_32 [0] : vector<8x8xf32> to vector<8xf32>
    %97 = vector.shape_cast %96 : vector<8xf32> to vector<1x8xf32>
    %98 = vector.broadcast %97 : vector<1x8xf32> to vector<8x8xf32>
    %99 = arith.subf %62, %98 : vector<8x8xf32>
    %100 = math.exp %99 : vector<8x8xf32>
    %cst_33 = arith.constant dense<0.000000e+00> : vector<8x8xf32>
    %101 = tpu.matmul %6, %100, %cst_33 {dimension_numbers = #tpu.dot_dimension_numbers<[1], [0], [0], [1], [0, 0, 1, 1], [], []>} : vector<8x8xf32>, vector<8x8xf32>, vector<8x8xf32> -> vector<8x8xf32>
    %102 = vector.broadcast %97 : vector<1x8xf32> to vector<8x8xf32>
    %103 = vector.broadcast %3 : vector<8x1xf32> to vector<8x8xf32>
    %104 = arith.addf %102, %103 : vector<8x8xf32>
    %105 = math.log %101 : vector<8x8xf32>
    %106 = arith.addf %104, %105 : vector<8x8xf32>
    %107 = arith.addf %106, %66 : vector<8x8xf32>
    %108 = vector.shape_cast %76 : vector<1x8xi1> to vector<1x8xi1>
    %109 = vector.broadcast %108 : vector<1x8xi1> to vector<8x8xi1>
    %110 = arith.select %109, %107, %62 : vector<8x8xi1>, vector<8x8xf32>
    %c2_i32 = arith.constant 2 : i32
    %111 = arith.index_cast %c2_i32 : i32 to index
    %c0_34 = arith.constant 0 : index
    %c0_35 = arith.constant 0 : index
    %112 = vector.load %arg2[%111, %c0_34, %c0_35] : memref<8x6x8xf32, #tpu.memory_space<vmem>>, vector<1x6x8xf32>
    %113 = vector.shape_cast %112 : vector<1x6x8xf32> to vector<6x8xf32>
    %114 = tpu.concatenate %113, %8 in 0 : vector<6x8xf32>, vector<2x8xf32> -> vector<8x8xf32>
    %115 = arith.index_cast %c2_i32 : i32 to index
    %c0_36 = arith.constant 0 : index
    %116 = vector.load %arg4[%115, %c0_36] : memref<8x8xi32, #tpu.memory_space<vmem>>, vector<1x8xi32>
    %c0_i32_37 = arith.constant 0 : i32
    %c5_i32_38 = arith.constant 5 : i32
    %117 = vector.broadcast %c0_i32_37 : i32 to vector<1x8xi32>
    %118 = arith.maxsi %117, %116 : vector<1x8xi32>
    %119 = vector.broadcast %c5_i32_38 : i32 to vector<1x8xi32>
    %120 = arith.minsi %119, %118 : vector<1x8xi32>
    %121 = arith.index_cast %c2_i32 : i32 to index
    %c0_39 = arith.constant 0 : index
    %122 = vector.load %arg3[%121, %c0_39] : memref<8x8xi32, #tpu.memory_space<vmem>>, vector<1x8xi32>
    %c0_i32_40 = arith.constant 0 : i32
    %123 = vector.broadcast %c0_i32_40 : i32 to vector<1x8xi32>
    %124 = arith.cmpi ne, %122, %123 : vector<1x8xi32>
    %125 = arith.extui %124 : vector<1x8xi1> to vector<1x8xi32>
    %126 = arith.sitofp %125 : vector<1x8xi32> to vector<1x8xf32>
    %127 = vector.broadcast %120 : vector<1x8xi32> to vector<8x8xi32>
    %128 = arith.cmpi eq, %7, %127 : vector<8x8xi32>
    %129 = arith.extui %128 : vector<8x8xi1> to vector<8x8xi32>
    %130 = arith.sitofp %129 : vector<8x8xi32> to vector<8x8xf32>
    %131 = arith.mulf %114, %130 : vector<8x8xf32>
    %cst_41 = arith.constant dense<0.000000e+00> : vector<8xf32>
    %132 = vector.multi_reduction <add>, %131, %cst_41 [0] : vector<8x8xf32> to vector<8xf32>
    %133 = vector.shape_cast %132 : vector<8xf32> to vector<1x8xf32>
    %cst_42 = arith.constant dense<0.000000e+00> : vector<8x8xf32>
    %134 = tpu.matmul %1, %95, %cst_42 {dimension_numbers = #tpu.dot_dimension_numbers<[1], [0], [0], [1], [0, 0, 1, 1], [], []>} : vector<8x8xf32>, vector<8x8xf32>, vector<8x8xf32> -> vector<8x8xf32>
    %135 = arith.mulf %134, %130 : vector<8x8xf32>
    %cst_43 = arith.constant dense<0.000000e+00> : vector<8xf32>
    %136 = vector.multi_reduction <add>, %135, %cst_43 [0] : vector<8x8xf32> to vector<8xf32>
    %137 = vector.shape_cast %136 : vector<8xf32> to vector<1x8xf32>
    %138 = arith.addf %133, %137 : vector<1x8xf32>
    %139 = arith.mulf %138, %126 : vector<1x8xf32>
    %140 = arith.addf %92, %139 : vector<1x8xf32>
    %141 = vector.shape_cast %124 : vector<1x8xi1> to vector<1x8xi1>
    %142 = vector.broadcast %141 : vector<1x8xi1> to vector<8x8xi1>
    %143 = arith.select %142, %130, %95 : vector<8x8xi1>, vector<8x8xf32>
    %cst_44 = arith.constant dense<0xFF800000> : vector<8xf32>
    %144 = vector.multi_reduction <maximumf>, %110, %cst_44 [0] : vector<8x8xf32> to vector<8xf32>
    %145 = vector.shape_cast %144 : vector<8xf32> to vector<1x8xf32>
    %146 = vector.broadcast %145 : vector<1x8xf32> to vector<8x8xf32>
    %147 = arith.subf %110, %146 : vector<8x8xf32>
    %148 = math.exp %147 : vector<8x8xf32>
    %cst_45 = arith.constant dense<0.000000e+00> : vector<8x8xf32>
    %149 = tpu.matmul %6, %148, %cst_45 {dimension_numbers = #tpu.dot_dimension_numbers<[1], [0], [0], [1], [0, 0, 1, 1], [], []>} : vector<8x8xf32>, vector<8x8xf32>, vector<8x8xf32> -> vector<8x8xf32>
    %150 = vector.broadcast %145 : vector<1x8xf32> to vector<8x8xf32>
    %151 = vector.broadcast %3 : vector<8x1xf32> to vector<8x8xf32>
    %152 = arith.addf %150, %151 : vector<8x8xf32>
    %153 = math.log %149 : vector<8x8xf32>
    %154 = arith.addf %152, %153 : vector<8x8xf32>
    %155 = arith.addf %154, %114 : vector<8x8xf32>
    %156 = vector.shape_cast %124 : vector<1x8xi1> to vector<1x8xi1>
    %157 = vector.broadcast %156 : vector<1x8xi1> to vector<8x8xi1>
    %158 = arith.select %157, %155, %110 : vector<8x8xi1>, vector<8x8xf32>
    %c3_i32 = arith.constant 3 : i32
    %159 = arith.index_cast %c3_i32 : i32 to index
    %c0_46 = arith.constant 0 : index
    %c0_47 = arith.constant 0 : index
    %160 = vector.load %arg2[%159, %c0_46, %c0_47] : memref<8x6x8xf32, #tpu.memory_space<vmem>>, vector<1x6x8xf32>
    %161 = vector.shape_cast %160 : vector<1x6x8xf32> to vector<6x8xf32>
    %162 = tpu.concatenate %161, %8 in 0 : vector<6x8xf32>, vector<2x8xf32> -> vector<8x8xf32>
    %163 = arith.index_cast %c3_i32 : i32 to index
    %c0_48 = arith.constant 0 : index
    %164 = vector.load %arg4[%163, %c0_48] : memref<8x8xi32, #tpu.memory_space<vmem>>, vector<1x8xi32>
    %c0_i32_49 = arith.constant 0 : i32
    %c5_i32_50 = arith.constant 5 : i32
    %165 = vector.broadcast %c0_i32_49 : i32 to vector<1x8xi32>
    %166 = arith.maxsi %165, %164 : vector<1x8xi32>
    %167 = vector.broadcast %c5_i32_50 : i32 to vector<1x8xi32>
    %168 = arith.minsi %167, %166 : vector<1x8xi32>
    %169 = arith.index_cast %c3_i32 : i32 to index
    %c0_51 = arith.constant 0 : index
    %170 = vector.load %arg3[%169, %c0_51] : memref<8x8xi32, #tpu.memory_space<vmem>>, vector<1x8xi32>
    %c0_i32_52 = arith.constant 0 : i32
    %171 = vector.broadcast %c0_i32_52 : i32 to vector<1x8xi32>
    %172 = arith.cmpi ne, %170, %171 : vector<1x8xi32>
    %173 = arith.extui %172 : vector<1x8xi1> to vector<1x8xi32>
    %174 = arith.sitofp %173 : vector<1x8xi32> to vector<1x8xf32>
    %175 = vector.broadcast %168 : vector<1x8xi32> to vector<8x8xi32>
    %176 = arith.cmpi eq, %7, %175 : vector<8x8xi32>
    %177 = arith.extui %176 : vector<8x8xi1> to vector<8x8xi32>
    %178 = arith.sitofp %177 : vector<8x8xi32> to vector<8x8xf32>
    %179 = arith.mulf %162, %178 : vector<8x8xf32>
    %cst_53 = arith.constant dense<0.000000e+00> : vector<8xf32>
    %180 = vector.multi_reduction <add>, %179, %cst_53 [0] : vector<8x8xf32> to vector<8xf32>
    %181 = vector.shape_cast %180 : vector<8xf32> to vector<1x8xf32>
    %cst_54 = arith.constant dense<0.000000e+00> : vector<8x8xf32>
    %182 = tpu.matmul %1, %143, %cst_54 {dimension_numbers = #tpu.dot_dimension_numbers<[1], [0], [0], [1], [0, 0, 1, 1], [], []>} : vector<8x8xf32>, vector<8x8xf32>, vector<8x8xf32> -> vector<8x8xf32>
    %183 = arith.mulf %182, %178 : vector<8x8xf32>
    %cst_55 = arith.constant dense<0.000000e+00> : vector<8xf32>
    %184 = vector.multi_reduction <add>, %183, %cst_55 [0] : vector<8x8xf32> to vector<8xf32>
    %185 = vector.shape_cast %184 : vector<8xf32> to vector<1x8xf32>
    %186 = arith.addf %181, %185 : vector<1x8xf32>
    %187 = arith.mulf %186, %174 : vector<1x8xf32>
    %188 = arith.addf %140, %187 : vector<1x8xf32>
    %189 = vector.shape_cast %172 : vector<1x8xi1> to vector<1x8xi1>
    %190 = vector.broadcast %189 : vector<1x8xi1> to vector<8x8xi1>
    %191 = arith.select %190, %178, %143 : vector<8x8xi1>, vector<8x8xf32>
    %cst_56 = arith.constant dense<0xFF800000> : vector<8xf32>
    %192 = vector.multi_reduction <maximumf>, %158, %cst_56 [0] : vector<8x8xf32> to vector<8xf32>
    %193 = vector.shape_cast %192 : vector<8xf32> to vector<1x8xf32>
    %194 = vector.broadcast %193 : vector<1x8xf32> to vector<8x8xf32>
    %195 = arith.subf %158, %194 : vector<8x8xf32>
    %196 = math.exp %195 : vector<8x8xf32>
    %cst_57 = arith.constant dense<0.000000e+00> : vector<8x8xf32>
    %197 = tpu.matmul %6, %196, %cst_57 {dimension_numbers = #tpu.dot_dimension_numbers<[1], [0], [0], [1], [0, 0, 1, 1], [], []>} : vector<8x8xf32>, vector<8x8xf32>, vector<8x8xf32> -> vector<8x8xf32>
    %198 = vector.broadcast %193 : vector<1x8xf32> to vector<8x8xf32>
    %199 = vector.broadcast %3 : vector<8x1xf32> to vector<8x8xf32>
    %200 = arith.addf %198, %199 : vector<8x8xf32>
    %201 = math.log %197 : vector<8x8xf32>
    %202 = arith.addf %200, %201 : vector<8x8xf32>
    %203 = arith.addf %202, %162 : vector<8x8xf32>
    %204 = vector.shape_cast %172 : vector<1x8xi1> to vector<1x8xi1>
    %205 = vector.broadcast %204 : vector<1x8xi1> to vector<8x8xi1>
    %206 = arith.select %205, %203, %158 : vector<8x8xi1>, vector<8x8xf32>
    %c4_i32 = arith.constant 4 : i32
    %207 = arith.index_cast %c4_i32 : i32 to index
    %c0_58 = arith.constant 0 : index
    %c0_59 = arith.constant 0 : index
    %208 = vector.load %arg2[%207, %c0_58, %c0_59] : memref<8x6x8xf32, #tpu.memory_space<vmem>>, vector<1x6x8xf32>
    %209 = vector.shape_cast %208 : vector<1x6x8xf32> to vector<6x8xf32>
    %210 = tpu.concatenate %209, %8 in 0 : vector<6x8xf32>, vector<2x8xf32> -> vector<8x8xf32>
    %211 = arith.index_cast %c4_i32 : i32 to index
    %c0_60 = arith.constant 0 : index
    %212 = vector.load %arg4[%211, %c0_60] : memref<8x8xi32, #tpu.memory_space<vmem>>, vector<1x8xi32>
    %c0_i32_61 = arith.constant 0 : i32
    %c5_i32_62 = arith.constant 5 : i32
    %213 = vector.broadcast %c0_i32_61 : i32 to vector<1x8xi32>
    %214 = arith.maxsi %213, %212 : vector<1x8xi32>
    %215 = vector.broadcast %c5_i32_62 : i32 to vector<1x8xi32>
    %216 = arith.minsi %215, %214 : vector<1x8xi32>
    %217 = arith.index_cast %c4_i32 : i32 to index
    %c0_63 = arith.constant 0 : index
    %218 = vector.load %arg3[%217, %c0_63] : memref<8x8xi32, #tpu.memory_space<vmem>>, vector<1x8xi32>
    %c0_i32_64 = arith.constant 0 : i32
    %219 = vector.broadcast %c0_i32_64 : i32 to vector<1x8xi32>
    %220 = arith.cmpi ne, %218, %219 : vector<1x8xi32>
    %221 = arith.extui %220 : vector<1x8xi1> to vector<1x8xi32>
    %222 = arith.sitofp %221 : vector<1x8xi32> to vector<1x8xf32>
    %223 = vector.broadcast %216 : vector<1x8xi32> to vector<8x8xi32>
    %224 = arith.cmpi eq, %7, %223 : vector<8x8xi32>
    %225 = arith.extui %224 : vector<8x8xi1> to vector<8x8xi32>
    %226 = arith.sitofp %225 : vector<8x8xi32> to vector<8x8xf32>
    %227 = arith.mulf %210, %226 : vector<8x8xf32>
    %cst_65 = arith.constant dense<0.000000e+00> : vector<8xf32>
    %228 = vector.multi_reduction <add>, %227, %cst_65 [0] : vector<8x8xf32> to vector<8xf32>
    %229 = vector.shape_cast %228 : vector<8xf32> to vector<1x8xf32>
    %cst_66 = arith.constant dense<0.000000e+00> : vector<8x8xf32>
    %230 = tpu.matmul %1, %191, %cst_66 {dimension_numbers = #tpu.dot_dimension_numbers<[1], [0], [0], [1], [0, 0, 1, 1], [], []>} : vector<8x8xf32>, vector<8x8xf32>, vector<8x8xf32> -> vector<8x8xf32>
    %231 = arith.mulf %230, %226 : vector<8x8xf32>
    %cst_67 = arith.constant dense<0.000000e+00> : vector<8xf32>
    %232 = vector.multi_reduction <add>, %231, %cst_67 [0] : vector<8x8xf32> to vector<8xf32>
    %233 = vector.shape_cast %232 : vector<8xf32> to vector<1x8xf32>
    %234 = arith.addf %229, %233 : vector<1x8xf32>
    %235 = arith.mulf %234, %222 : vector<1x8xf32>
    %236 = arith.addf %188, %235 : vector<1x8xf32>
    %237 = vector.shape_cast %220 : vector<1x8xi1> to vector<1x8xi1>
    %238 = vector.broadcast %237 : vector<1x8xi1> to vector<8x8xi1>
    %239 = arith.select %238, %226, %191 : vector<8x8xi1>, vector<8x8xf32>
    %cst_68 = arith.constant dense<0xFF800000> : vector<8xf32>
    %240 = vector.multi_reduction <maximumf>, %206, %cst_68 [0] : vector<8x8xf32> to vector<8xf32>
    %241 = vector.shape_cast %240 : vector<8xf32> to vector<1x8xf32>
    %242 = vector.broadcast %241 : vector<1x8xf32> to vector<8x8xf32>
    %243 = arith.subf %206, %242 : vector<8x8xf32>
    %244 = math.exp %243 : vector<8x8xf32>
    %cst_69 = arith.constant dense<0.000000e+00> : vector<8x8xf32>
    %245 = tpu.matmul %6, %244, %cst_69 {dimension_numbers = #tpu.dot_dimension_numbers<[1], [0], [0], [1], [0, 0, 1, 1], [], []>} : vector<8x8xf32>, vector<8x8xf32>, vector<8x8xf32> -> vector<8x8xf32>
    %246 = vector.broadcast %241 : vector<1x8xf32> to vector<8x8xf32>
    %247 = vector.broadcast %3 : vector<8x1xf32> to vector<8x8xf32>
    %248 = arith.addf %246, %247 : vector<8x8xf32>
    %249 = math.log %245 : vector<8x8xf32>
    %250 = arith.addf %248, %249 : vector<8x8xf32>
    %251 = arith.addf %250, %210 : vector<8x8xf32>
    %252 = vector.shape_cast %220 : vector<1x8xi1> to vector<1x8xi1>
    %253 = vector.broadcast %252 : vector<1x8xi1> to vector<8x8xi1>
    %254 = arith.select %253, %251, %206 : vector<8x8xi1>, vector<8x8xf32>
    %c5_i32_70 = arith.constant 5 : i32
    %255 = arith.index_cast %c5_i32_70 : i32 to index
    %c0_71 = arith.constant 0 : index
    %c0_72 = arith.constant 0 : index
    %256 = vector.load %arg2[%255, %c0_71, %c0_72] : memref<8x6x8xf32, #tpu.memory_space<vmem>>, vector<1x6x8xf32>
    %257 = vector.shape_cast %256 : vector<1x6x8xf32> to vector<6x8xf32>
    %258 = tpu.concatenate %257, %8 in 0 : vector<6x8xf32>, vector<2x8xf32> -> vector<8x8xf32>
    %259 = arith.index_cast %c5_i32_70 : i32 to index
    %c0_73 = arith.constant 0 : index
    %260 = vector.load %arg4[%259, %c0_73] : memref<8x8xi32, #tpu.memory_space<vmem>>, vector<1x8xi32>
    %c0_i32_74 = arith.constant 0 : i32
    %c5_i32_75 = arith.constant 5 : i32
    %261 = vector.broadcast %c0_i32_74 : i32 to vector<1x8xi32>
    %262 = arith.maxsi %261, %260 : vector<1x8xi32>
    %263 = vector.broadcast %c5_i32_75 : i32 to vector<1x8xi32>
    %264 = arith.minsi %263, %262 : vector<1x8xi32>
    %265 = arith.index_cast %c5_i32_70 : i32 to index
    %c0_76 = arith.constant 0 : index
    %266 = vector.load %arg3[%265, %c0_76] : memref<8x8xi32, #tpu.memory_space<vmem>>, vector<1x8xi32>
    %c0_i32_77 = arith.constant 0 : i32
    %267 = vector.broadcast %c0_i32_77 : i32 to vector<1x8xi32>
    %268 = arith.cmpi ne, %266, %267 : vector<1x8xi32>
    %269 = arith.extui %268 : vector<1x8xi1> to vector<1x8xi32>
    %270 = arith.sitofp %269 : vector<1x8xi32> to vector<1x8xf32>
    %271 = vector.broadcast %264 : vector<1x8xi32> to vector<8x8xi32>
    %272 = arith.cmpi eq, %7, %271 : vector<8x8xi32>
    %273 = arith.extui %272 : vector<8x8xi1> to vector<8x8xi32>
    %274 = arith.sitofp %273 : vector<8x8xi32> to vector<8x8xf32>
    %275 = arith.mulf %258, %274 : vector<8x8xf32>
    %cst_78 = arith.constant dense<0.000000e+00> : vector<8xf32>
    %276 = vector.multi_reduction <add>, %275, %cst_78 [0] : vector<8x8xf32> to vector<8xf32>
    %277 = vector.shape_cast %276 : vector<8xf32> to vector<1x8xf32>
    %cst_79 = arith.constant dense<0.000000e+00> : vector<8x8xf32>
    %278 = tpu.matmul %1, %239, %cst_79 {dimension_numbers = #tpu.dot_dimension_numbers<[1], [0], [0], [1], [0, 0, 1, 1], [], []>} : vector<8x8xf32>, vector<8x8xf32>, vector<8x8xf32> -> vector<8x8xf32>
    %279 = arith.mulf %278, %274 : vector<8x8xf32>
    %cst_80 = arith.constant dense<0.000000e+00> : vector<8xf32>
    %280 = vector.multi_reduction <add>, %279, %cst_80 [0] : vector<8x8xf32> to vector<8xf32>
    %281 = vector.shape_cast %280 : vector<8xf32> to vector<1x8xf32>
    %282 = arith.addf %277, %281 : vector<1x8xf32>
    %283 = arith.mulf %282, %270 : vector<1x8xf32>
    %284 = arith.addf %236, %283 : vector<1x8xf32>
    %285 = vector.shape_cast %268 : vector<1x8xi1> to vector<1x8xi1>
    %286 = vector.broadcast %285 : vector<1x8xi1> to vector<8x8xi1>
    %287 = arith.select %286, %274, %239 : vector<8x8xi1>, vector<8x8xf32>
    %cst_81 = arith.constant dense<0xFF800000> : vector<8xf32>
    %288 = vector.multi_reduction <maximumf>, %254, %cst_81 [0] : vector<8x8xf32> to vector<8xf32>
    %289 = vector.shape_cast %288 : vector<8xf32> to vector<1x8xf32>
    %290 = vector.broadcast %289 : vector<1x8xf32> to vector<8x8xf32>
    %291 = arith.subf %254, %290 : vector<8x8xf32>
    %292 = math.exp %291 : vector<8x8xf32>
    %cst_82 = arith.constant dense<0.000000e+00> : vector<8x8xf32>
    %293 = tpu.matmul %6, %292, %cst_82 {dimension_numbers = #tpu.dot_dimension_numbers<[1], [0], [0], [1], [0, 0, 1, 1], [], []>} : vector<8x8xf32>, vector<8x8xf32>, vector<8x8xf32> -> vector<8x8xf32>
    %294 = vector.broadcast %289 : vector<1x8xf32> to vector<8x8xf32>
    %295 = vector.broadcast %3 : vector<8x1xf32> to vector<8x8xf32>
    %296 = arith.addf %294, %295 : vector<8x8xf32>
    %297 = math.log %293 : vector<8x8xf32>
    %298 = arith.addf %296, %297 : vector<8x8xf32>
    %299 = arith.addf %298, %258 : vector<8x8xf32>
    %300 = vector.shape_cast %268 : vector<1x8xi1> to vector<1x8xi1>
    %301 = vector.broadcast %300 : vector<1x8xi1> to vector<8x8xi1>
    %302 = arith.select %301, %299, %254 : vector<8x8xi1>, vector<8x8xf32>
    %c6_i32 = arith.constant 6 : i32
    %303 = arith.index_cast %c6_i32 : i32 to index
    %c0_83 = arith.constant 0 : index
    %c0_84 = arith.constant 0 : index
    %304 = vector.load %arg2[%303, %c0_83, %c0_84] : memref<8x6x8xf32, #tpu.memory_space<vmem>>, vector<1x6x8xf32>
    %305 = vector.shape_cast %304 : vector<1x6x8xf32> to vector<6x8xf32>
    %306 = tpu.concatenate %305, %8 in 0 : vector<6x8xf32>, vector<2x8xf32> -> vector<8x8xf32>
    %307 = arith.index_cast %c6_i32 : i32 to index
    %c0_85 = arith.constant 0 : index
    %308 = vector.load %arg4[%307, %c0_85] : memref<8x8xi32, #tpu.memory_space<vmem>>, vector<1x8xi32>
    %c0_i32_86 = arith.constant 0 : i32
    %c5_i32_87 = arith.constant 5 : i32
    %309 = vector.broadcast %c0_i32_86 : i32 to vector<1x8xi32>
    %310 = arith.maxsi %309, %308 : vector<1x8xi32>
    %311 = vector.broadcast %c5_i32_87 : i32 to vector<1x8xi32>
    %312 = arith.minsi %311, %310 : vector<1x8xi32>
    %313 = arith.index_cast %c6_i32 : i32 to index
    %c0_88 = arith.constant 0 : index
    %314 = vector.load %arg3[%313, %c0_88] : memref<8x8xi32, #tpu.memory_space<vmem>>, vector<1x8xi32>
    %c0_i32_89 = arith.constant 0 : i32
    %315 = vector.broadcast %c0_i32_89 : i32 to vector<1x8xi32>
    %316 = arith.cmpi ne, %314, %315 : vector<1x8xi32>
    %317 = arith.extui %316 : vector<1x8xi1> to vector<1x8xi32>
    %318 = arith.sitofp %317 : vector<1x8xi32> to vector<1x8xf32>
    %319 = vector.broadcast %312 : vector<1x8xi32> to vector<8x8xi32>
    %320 = arith.cmpi eq, %7, %319 : vector<8x8xi32>
    %321 = arith.extui %320 : vector<8x8xi1> to vector<8x8xi32>
    %322 = arith.sitofp %321 : vector<8x8xi32> to vector<8x8xf32>
    %323 = arith.mulf %306, %322 : vector<8x8xf32>
    %cst_90 = arith.constant dense<0.000000e+00> : vector<8xf32>
    %324 = vector.multi_reduction <add>, %323, %cst_90 [0] : vector<8x8xf32> to vector<8xf32>
    %325 = vector.shape_cast %324 : vector<8xf32> to vector<1x8xf32>
    %cst_91 = arith.constant dense<0.000000e+00> : vector<8x8xf32>
    %326 = tpu.matmul %1, %287, %cst_91 {dimension_numbers = #tpu.dot_dimension_numbers<[1], [0], [0], [1], [0, 0, 1, 1], [], []>} : vector<8x8xf32>, vector<8x8xf32>, vector<8x8xf32> -> vector<8x8xf32>
    %327 = arith.mulf %326, %322 : vector<8x8xf32>
    %cst_92 = arith.constant dense<0.000000e+00> : vector<8xf32>
    %328 = vector.multi_reduction <add>, %327, %cst_92 [0] : vector<8x8xf32> to vector<8xf32>
    %329 = vector.shape_cast %328 : vector<8xf32> to vector<1x8xf32>
    %330 = arith.addf %325, %329 : vector<1x8xf32>
    %331 = arith.mulf %330, %318 : vector<1x8xf32>
    %332 = arith.addf %284, %331 : vector<1x8xf32>
    %333 = vector.shape_cast %316 : vector<1x8xi1> to vector<1x8xi1>
    %334 = vector.broadcast %333 : vector<1x8xi1> to vector<8x8xi1>
    %335 = arith.select %334, %322, %287 : vector<8x8xi1>, vector<8x8xf32>
    %cst_93 = arith.constant dense<0xFF800000> : vector<8xf32>
    %336 = vector.multi_reduction <maximumf>, %302, %cst_93 [0] : vector<8x8xf32> to vector<8xf32>
    %337 = vector.shape_cast %336 : vector<8xf32> to vector<1x8xf32>
    %338 = vector.broadcast %337 : vector<1x8xf32> to vector<8x8xf32>
    %339 = arith.subf %302, %338 : vector<8x8xf32>
    %340 = math.exp %339 : vector<8x8xf32>
    %cst_94 = arith.constant dense<0.000000e+00> : vector<8x8xf32>
    %341 = tpu.matmul %6, %340, %cst_94 {dimension_numbers = #tpu.dot_dimension_numbers<[1], [0], [0], [1], [0, 0, 1, 1], [], []>} : vector<8x8xf32>, vector<8x8xf32>, vector<8x8xf32> -> vector<8x8xf32>
    %342 = vector.broadcast %337 : vector<1x8xf32> to vector<8x8xf32>
    %343 = vector.broadcast %3 : vector<8x1xf32> to vector<8x8xf32>
    %344 = arith.addf %342, %343 : vector<8x8xf32>
    %345 = math.log %341 : vector<8x8xf32>
    %346 = arith.addf %344, %345 : vector<8x8xf32>
    %347 = arith.addf %346, %306 : vector<8x8xf32>
    %348 = vector.shape_cast %316 : vector<1x8xi1> to vector<1x8xi1>
    %349 = vector.broadcast %348 : vector<1x8xi1> to vector<8x8xi1>
    %350 = arith.select %349, %347, %302 : vector<8x8xi1>, vector<8x8xf32>
    %c7_i32 = arith.constant 7 : i32
    %351 = arith.index_cast %c7_i32 : i32 to index
    %c0_95 = arith.constant 0 : index
    %c0_96 = arith.constant 0 : index
    %352 = vector.load %arg2[%351, %c0_95, %c0_96] : memref<8x6x8xf32, #tpu.memory_space<vmem>>, vector<1x6x8xf32>
    %353 = vector.shape_cast %352 : vector<1x6x8xf32> to vector<6x8xf32>
    %354 = tpu.concatenate %353, %8 in 0 : vector<6x8xf32>, vector<2x8xf32> -> vector<8x8xf32>
    %355 = arith.index_cast %c7_i32 : i32 to index
    %c0_97 = arith.constant 0 : index
    %356 = vector.load %arg4[%355, %c0_97] : memref<8x8xi32, #tpu.memory_space<vmem>>, vector<1x8xi32>
    %c0_i32_98 = arith.constant 0 : i32
    %c5_i32_99 = arith.constant 5 : i32
    %357 = vector.broadcast %c0_i32_98 : i32 to vector<1x8xi32>
    %358 = arith.maxsi %357, %356 : vector<1x8xi32>
    %359 = vector.broadcast %c5_i32_99 : i32 to vector<1x8xi32>
    %360 = arith.minsi %359, %358 : vector<1x8xi32>
    %361 = arith.index_cast %c7_i32 : i32 to index
    %c0_100 = arith.constant 0 : index
    %362 = vector.load %arg3[%361, %c0_100] : memref<8x8xi32, #tpu.memory_space<vmem>>, vector<1x8xi32>
    %c0_i32_101 = arith.constant 0 : i32
    %363 = vector.broadcast %c0_i32_101 : i32 to vector<1x8xi32>
    %364 = arith.cmpi ne, %362, %363 : vector<1x8xi32>
    %365 = arith.extui %364 : vector<1x8xi1> to vector<1x8xi32>
    %366 = arith.sitofp %365 : vector<1x8xi32> to vector<1x8xf32>
    %367 = vector.broadcast %360 : vector<1x8xi32> to vector<8x8xi32>
    %368 = arith.cmpi eq, %7, %367 : vector<8x8xi32>
    %369 = arith.extui %368 : vector<8x8xi1> to vector<8x8xi32>
    %370 = arith.sitofp %369 : vector<8x8xi32> to vector<8x8xf32>
    %371 = arith.mulf %354, %370 : vector<8x8xf32>
    %cst_102 = arith.constant dense<0.000000e+00> : vector<8xf32>
    %372 = vector.multi_reduction <add>, %371, %cst_102 [0] : vector<8x8xf32> to vector<8xf32>
    %373 = vector.shape_cast %372 : vector<8xf32> to vector<1x8xf32>
    %cst_103 = arith.constant dense<0.000000e+00> : vector<8x8xf32>
    %374 = tpu.matmul %1, %335, %cst_103 {dimension_numbers = #tpu.dot_dimension_numbers<[1], [0], [0], [1], [0, 0, 1, 1], [], []>} : vector<8x8xf32>, vector<8x8xf32>, vector<8x8xf32> -> vector<8x8xf32>
    %375 = arith.mulf %374, %370 : vector<8x8xf32>
    %cst_104 = arith.constant dense<0.000000e+00> : vector<8xf32>
    %376 = vector.multi_reduction <add>, %375, %cst_104 [0] : vector<8x8xf32> to vector<8xf32>
    %377 = vector.shape_cast %376 : vector<8xf32> to vector<1x8xf32>
    %378 = arith.addf %373, %377 : vector<1x8xf32>
    %379 = arith.mulf %378, %366 : vector<1x8xf32>
    %380 = arith.addf %332, %379 : vector<1x8xf32>
    %381 = vector.shape_cast %364 : vector<1x8xi1> to vector<1x8xi1>
    %382 = vector.broadcast %381 : vector<1x8xi1> to vector<8x8xi1>
    %383 = arith.select %382, %370, %335 : vector<8x8xi1>, vector<8x8xf32>
    %cst_105 = arith.constant dense<0xFF800000> : vector<8xf32>
    %384 = vector.multi_reduction <maximumf>, %350, %cst_105 [0] : vector<8x8xf32> to vector<8xf32>
    %385 = vector.shape_cast %384 : vector<8xf32> to vector<1x8xf32>
    %386 = vector.broadcast %385 : vector<1x8xf32> to vector<8x8xf32>
    %387 = arith.subf %350, %386 : vector<8x8xf32>
    %388 = math.exp %387 : vector<8x8xf32>
    %cst_106 = arith.constant dense<0.000000e+00> : vector<8x8xf32>
    %389 = tpu.matmul %6, %388, %cst_106 {dimension_numbers = #tpu.dot_dimension_numbers<[1], [0], [0], [1], [0, 0, 1, 1], [], []>} : vector<8x8xf32>, vector<8x8xf32>, vector<8x8xf32> -> vector<8x8xf32>
    %390 = vector.broadcast %385 : vector<1x8xf32> to vector<8x8xf32>
    %391 = vector.broadcast %3 : vector<8x1xf32> to vector<8x8xf32>
    %392 = arith.addf %390, %391 : vector<8x8xf32>
    %393 = math.log %389 : vector<8x8xf32>
    %394 = arith.addf %392, %393 : vector<8x8xf32>
    %395 = arith.addf %394, %354 : vector<8x8xf32>
    %396 = vector.shape_cast %364 : vector<1x8xi1> to vector<1x8xi1>
    %397 = vector.broadcast %396 : vector<1x8xi1> to vector<8x8xi1>
    %398 = arith.select %397, %395, %350 : vector<8x8xi1>, vector<8x8xf32>
    %c8_i32 = arith.constant 8 : i32
    %c0_107 = arith.constant 0 : index
    %c0_108 = arith.constant 0 : index
    %399 = vector.load %arg9[%c0_107, %c0_108] : memref<1x8xf32, #tpu.memory_space<vmem>>, vector<1x8xf32>
    tpu.vector_store %arg9[%c0_107, %c0_108], %380 {strides = array<i32>} : memref<1x8xf32, #tpu.memory_space<vmem>>, vector<1x8xf32>,
    %c0_109 = arith.constant 0 : index
    %c0_110 = arith.constant 0 : index
    %400 = vector.load %arg8[%c0_109, %c0_110] : memref<8x8xf32, #tpu.memory_space<vmem>>, vector<8x8xf32>
    tpu.vector_store %arg8[%c0_109, %c0_110], %383 {strides = array<i32>} : memref<8x8xf32, #tpu.memory_space<vmem>>, vector<8x8xf32>,
    %c0_111 = arith.constant 0 : index
    %c0_112 = arith.constant 0 : index
    %401 = vector.load %arg7[%c0_111, %c0_112] : memref<8x8xf32, #tpu.memory_space<vmem>>, vector<8x8xf32>
    tpu.vector_store %arg7[%c0_111, %c0_112], %398 {strides = array<i32>} : memref<8x8xf32, #tpu.memory_space<vmem>>, vector<8x8xf32>,
    %c0_i32_113 = arith.constant 0 : i32
    %402 = arith.cmpi eq, %arg1, %c0_i32_113 : i32
    %403 = arith.extui %402 : i1 to i32
    %c0_i32_114 = arith.constant 0 : i32
    %404 = arith.cmpi ne, %403, %c0_i32_114 : i32
    scf.if %404 {
      %405 = vector.extract_strided_slice %0 {offsets = [0, 7], sizes = [8, 1], strides = [1, 1]} : vector<8x8xf32> to vector<8x1xf32>
      %406 = vector.broadcast %405 : vector<8x1xf32> to vector<8x8xf32>
      %407 = arith.mulf %383, %406 : vector<8x8xf32>
      %cst_115 = arith.constant dense<0.000000e+00> : vector<8xf32>
      %408 = vector.multi_reduction <add>, %407, %cst_115 [0] : vector<8x8xf32> to vector<8xf32>
      %409 = vector.shape_cast %408 : vector<8xf32> to vector<1x8xf32>
      %410 = arith.addf %380, %409 : vector<1x8xf32>
      %411 = vector.broadcast %405 : vector<8x1xf32> to vector<8x8xf32>
      %412 = arith.addf %398, %411 : vector<8x8xf32>
      %cst_116 = arith.constant dense<0xFF800000> : vector<8xf32>
      %413 = vector.multi_reduction <maximumf>, %412, %cst_116 [0] : vector<8x8xf32> to vector<8xf32>
      %414 = vector.shape_cast %413 : vector<8xf32> to vector<1x8xf32>
      %415 = vector.broadcast %414 : vector<1x8xf32> to vector<8x8xf32>
      %416 = arith.subf %412, %415 : vector<8x8xf32>
      %417 = math.exp %416 : vector<8x8xf32>
      %cst_117 = arith.constant dense<0.000000e+00> : vector<8xf32>
      %418 = vector.multi_reduction <add>, %417, %cst_117 [0] : vector<8x8xf32> to vector<8xf32>
      %419 = vector.shape_cast %418 : vector<8xf32> to vector<1x8xf32>
      %420 = math.log %419 : vector<1x8xf32>
      %421 = arith.addf %414, %420 : vector<1x8xf32>
      %422 = arith.subf %410, %421 : vector<1x8xf32>
      %c0_118 = arith.constant 0 : index
      %c0_119 = arith.constant 0 : index
      %423 = vector.load %arg6[%c0_118, %c0_119] : memref<1x8xf32, #tpu.memory_space<vmem>>, vector<1x8xf32>
      tpu.vector_store %arg6[%c0_118, %c0_119], %422 {strides = array<i32>} : memref<1x8xf32, #tpu.memory_space<vmem>>, vector<1x8xf32>,
    } else {
    }
    return
  }
  func.func @transform_0(%arg0: i32, %arg1: i32) -> (i32, i32, i32) {
    %c0_i32 = arith.constant 0 : i32
    %c0_i32_0 = arith.constant 0 : i32
    return %arg1, %c0_i32, %arg0 : i32, i32, i32
  }
  func.func @transform_1(%arg0: i32, %arg1: i32) -> (i32, i32) {
    %c0_i32 = arith.constant 0 : i32
    return %arg1, %arg0 : i32, i32
  }
  func.func @transform_2(%arg0: i32, %arg1: i32) -> (i32, i32) {
    %c0_i32 = arith.constant 0 : i32
    return %arg1, %arg0 : i32, i32
  }
  func.func @transform_3(%arg0: i32, %arg1: i32) -> (i32, i32) {
    %c0_i32 = arith.constant 0 : i32
    %c0_i32_0 = arith.constant 0 : i32
    %c0_i32_1 = arith.constant 0 : i32
    return %c0_i32, %c0_i32_0 : i32, i32
  }
  func.func @transform_4(%arg0: i32, %arg1: i32) -> (i32, i32) {
    %c0_i32 = arith.constant 0 : i32
    %c0_i32_0 = arith.constant 0 : i32
    return %c0_i32, %arg0 : i32, i32
  }
}

</mosaic_0001>

<bundles_post_ra>
// kernel: tpu_custom_call.1
= control target key start
LH: loop header
LB: loop body
LE: loop exit
PB: predicated region body
PF: predicated region fallthrough
CT: control target
= control target key end

     0   :  { %v58_v1 = vlaneseq  ;;  %v2517_v2 = vmov 0.0   ;;  %vm1962_vm0 = vmmov 0   ;;  %vm51_vm1 = vcmask 64512   ;;  %s2507_s0 = inlined_call_operand.vmem [shape: f32[8,6,8], index: 0, kind: input, shape index: {}]   ;;  %s2508_s1 = inlined_call_operand.vmem [shape: s32[8,8], index: 1, kind: input, shape index: {}]   ;;  %s2509_s2 = inlined_call_operand.vmem [shape: s32[8,8], index: 2, kind: input, shape index: {}]   ;;  %s2510_s3 = inlined_call_operand.vmem [shape: f32[8,8], index: 3, kind: input, shape index: {}]   ;;  %s2511_s4 = inlined_call_operand.hbm [shape: f32[1,8], index: 4, kind: output, shape index: {}]  }
   0x1   :  { %v18_v0 = vld [vmem:[%s2510_s3] sm:$0xff]  ;;  %1811 = vmatprep.subr.mxu0 %v2517_v2  ;;  %1813 = vmatprep.mubr.msk.f32.mxu0 %vm1962_vm0, %v2517_v2  ;;  %v1963_v4 = vmov -10000.0  }
   0x2   :  { %19 = vxpose.xlu0.b32.start.end [1/1] (short) (narrow) %v18_v0, 8  ;;  %v1996_v3 = vshrl.u32 %v58_v1, 7  ;;  %1816 = vmatprep.subr.mxu1 %v2517_v2 }
   0x3   :  { %1818 = vmatprep.mubr.msk.f32.mxu1 %vm1962_vm0, %v2517_v2 }
   0x4   :  { %vm64_vm2 = vcmp.eq.s32.totalorder %v1996_v3, 6 }
   0x5   :  { %v65_v5 = vsel %vm64_vm2, 0.0, %v1963_v4  ;;  %v1739_v6 = vsel %vm64_vm2, 1.0, %v2517_v2 }
   0x6   :  { %66 = vst.msk [vmem:[#allocation2] sm:$0xff] %vm51_vm1, %v65_v5  ;;  %69 = vst.msk [vmem:[#allocation3] sm:$0xff] %vm51_vm1, %v1739_v6 }
   0x7   :  { %9 = vsyncpa [#allocation6], 0  ;;  %v1964_v8 = vmov 7   ;;  %v78_v9 = vld [vmem:[%s2509_s2] sm:$0x1]  ;;  %v2023_v15 = vsub.s32 0, %v1996_v3 }
   0x8   :  { %1897 = vset.pattern.permute.xlu1 %v1964_v8  ;;  %vm79_vm3 = vcmp.gt.s32.totalorder %v78_v9, 0  ;;  %v284_v10 = vld [vmem:[%s2509_s2 + $0x1] sm:$0x1]  ;;  %v484_v12 = vld [vmem:[%s2509_s2 + $0x2] sm:$0x1]  ;;  %v1965_v20 = vmov 0  }
   0x9   :  { %1690 = vperm.xlu1 %1897, %v18_v0   ;;  %v80_v11 = vsel %vm79_vm3, %v78_v9, 0  ;;  %vm285_vm4 = vcmp.gt.s32.totalorder %v284_v10, 0  ;;  %v2020_v13 = vld [vmem:[%s2508_s1] sm:$0x1]  ;;  %vm485_vm6 = vcmp.gt.s32.totalorder %v484_v12, 0 }
   0xa   :  { %vm81_vm5 = vcmp.lt.s32.totalorder %v80_v11, 5  ;;  %v286_v14 = vsel %vm285_vm4, %v284_v10, 0  ;;  %vm84_vm7 = vcmp.ne.s32.totalorder %v2020_v13, 0  ;;  %v2029_v17 = vld [vmem:[%s2508_s1 + $0x1] sm:$0x1]  ;;  %v486_v19 = vsel %vm485_vm6, %v484_v12, 0 }
   0xb   :  { %v82_v16 = vsel %vm81_vm5, %v80_v11, 5  ;;  %v684_v18 = vld [vmem:[%s2509_s2 + $0x3] sm:$0x1]  ;;  %vm287_vm8 = vcmp.lt.s32.totalorder %v286_v14, 5  ;;  %v85_v21 = vsel %vm84_vm7, 1, %v1965_v20  ;;  %vm290_vm9 = vcmp.ne.s32.totalorder %v2029_v17, 0 }
   0xc   :  { %v90_v22 = vrot.slane %v82_v16, %v2023_v15  ;;  %vm685_vm10 = vcmp.gt.s32.totalorder %v684_v18, 0  ;;  %v288_v23 = vsel %vm287_vm8, %v286_v14, 5  ;;  %vm487_vm11 = vcmp.lt.s32.totalorder %v486_v19, 5  ;;  %v884_v24 = vld [vmem:[%s2509_s2 + $0x4] sm:$0x1] }
   0xd   :  { %v73_v7 = vld [vmem:[#allocation3] sm:$0xff]  ;;  %v2045_v25 = vld [vmem:[%s2508_s1 + $0x2] sm:$0x1]  ;;  %v189_v26 = vrot.slane %v85_v21, %v2023_v15  ;;  %v291_v27 = vsel %vm290_vm9, 1, %v1965_v20  ;;  %v686_v28 = vsel %vm685_vm10, %v684_v18, 0  ;;  %v296_v29 = vrot.slane %v288_v23, %v2023_v15 }
   0xe   :  { %1812 = vmatpush3.msra.mxu0 %v73_v7  ;;  %vm91_vm12 = vcmp.eq.s32.totalorder %v1996_v3, %v90_v22  ;;  %v488_v30 = vsel %vm487_vm11, %v486_v19, 5  ;;  %vm885_vm13 = vcmp.gt.s32.totalorder %v884_v24, 0  ;;  %vm2516_vm14 = vcmp.ne.s32.totalorder %v2045_v25, 0  ;;  %v1084_v31 = vld [vmem:[%s2509_s2 + $0x5] sm:$0x1] }
   0xf   :  { %1821 = vmatprep.subr.mxu0 %v2517_v2  ;;  %v392_v32 = vrot.slane %v291_v27, %v2023_v15  ;;  %vm687_vm15 = vcmp.lt.s32.totalorder %v686_v28, 5  ;;  %v2061_v33 = vld [vmem:[%s2508_s1 + $0x3] sm:$0x1]  ;;  %v2064_v34 = vsel %vm91_vm12, 1.0, %v2517_v2  ;;  %vm2066_vm2 = vcmp.eq.s32.totalorder %v189_v26, 1 }
  0x10   :  { %v496_v36 = vrot.slane %v488_v30, %v2023_v15  ;;  %v886_v37 = vsel %vm885_vm13, %v884_v24, 0  ;;  %vm297_vm3 = vcmp.eq.s32.totalorder %v1996_v3, %v296_v29  ;;  %v491_v38 = vsel %vm2516_vm14, 1, %v1965_v20  ;;  %v1284_v40 = vld [vmem:[%s2509_s2 + $0x6] sm:$0x1]  ;;  %v2089_v43 = vld [vmem:[%s2508_s1 + $0x4] sm:$0x1] }
  0x11   :  { %vm1085_vm4 = vcmp.gt.s32.totalorder %v1084_v31, 0  ;;  %v688_v39 = vsel %vm687_vm15, %v686_v28, 5  ;;  %vm2515_vm5 = vcmp.ne.s32.totalorder %v2061_v33, 0  ;;  %v191_v41 = vsel %vm2066_vm2, %v2064_v34, %v73_v7  ;;  %v2110_v52 = vld [vmem:[#allocation2] sm:$0xff] }
  0x12   :  { %vm2082_vm6 = vcmp.eq.s32.totalorder %v392_v32, 1  ;;  %vm887_vm8 = vcmp.lt.s32.totalorder %v886_v37, 5  ;;  %v2094_v45 = vsel %vm297_vm3, 1.0, %v2517_v2  ;;  %vm2097_vm10 = vcmp.eq.s32.totalorder %v1996_v3, %v496_v36  ;;  %v2124_v56 = vld [vmem:[%s2508_s1 + $0x5] sm:$0x1] }
  0x13   :  { %v592_v47 = vrot.slane %v491_v38, %v2023_v15  ;;  %v1086_v48 = vsel %vm1085_vm4, %v1084_v31, 0  ;;  %v691_v50 = vsel %vm2515_vm5, 1, %v1965_v20  ;;  %v696_v51 = vrot.slane %v688_v39, %v2023_v15  ;;  %v2154_v5 = vld [vmem:[%s2508_s1 + $0x6] sm:$0x1] }
  0x14   :  { %vm1285_vm11 = vcmp.gt.s32.totalorder %v1284_v40, 0  ;;  %v888_v53 = vsel %vm887_vm8, %v886_v37, 5  ;;  %vm2514_vm12 = vcmp.ne.s32.totalorder %v2089_v43, 0  ;;  %v192_v54 = vsel %vm51_vm1, %v2110_v52, -inf }
  0x15   :  { %v394_v55 = vsel %vm2082_vm6, %v2094_v45, %v191_v41  ;;  %vm1087_vm13 = vcmp.lt.s32.totalorder %v1086_v48, 5  ;;  %v193_v57 = vrot.slane %v192_v54, 4  ;;  %v2129_v58 = vsel %vm2097_vm10, 1.0, %v2517_v2 }
  0x16   :  { %vm2131_vm15 = vcmp.eq.s32.totalorder %v592_v47, 1  ;;  %v792_v60 = vrot.slane %v691_v50, %v2023_v15  ;;  %v1286_v61 = vsel %vm1285_vm11, %v1284_v40, 0  ;;  %vm697_vm3 = vcmp.eq.s32.totalorder %v1996_v3, %v696_v51 }
  0x17   :  { %v891_v62 = vsel %vm2514_vm12, 1, %v1965_v20  ;;  %v896_v63 = vrot.slane %v888_v53, %v2023_v15  ;;  %v194_v0 = vmax.f32 %v192_v54, %v193_v57  ;;  %v1088_v1 = vsel %vm1087_vm13, %v1086_v48, 5 }
  0x18   :  { %vm2513_vm4 = vcmp.ne.s32.totalorder %v2124_v56, 0  ;;  %v594_v4 = vsel %vm2131_vm15, %v2129_v58, %v394_v55  ;;  %vm1287_vm8 = vcmp.lt.s32.totalorder %v1286_v61, 5  ;;  %v2157_v7 = vsel %vm697_vm3, 1.0, %v2517_v2 }
  0x19   :  { %v195_v6 = vrot.slane %v194_v0, 2  ;;  %vm2159_vm10 = vcmp.eq.s32.totalorder %v792_v60, 1  ;;  %v992_v9 = vrot.slane %v891_v62, %v2023_v15  ;;  %vm897_vm11 = vcmp.eq.s32.totalorder %v1996_v3, %v896_v63  ;;  %v75_v60 = vld [vmem:[%s2507_s0] sm:$0x3f] }
  0x1a   :  { %v1091_v10 = vsel %vm2513_vm4, 1, %v1965_v20  ;;  %v1096_v11 = vrot.slane %v1088_v1, %v2023_v15  ;;  %v1288_v14 = vsel %vm1287_vm8, %v1286_v61, 5  ;;  %vm2512_vm13 = vcmp.ne.s32.totalorder %v2154_v5, 0  ;;  %v1744_v61 = vld [vmem:[%s2507_s0 + $0x8] sm:$0x3f] }
  0x1b   :  { %v196_v12 = vmax.f32 %v194_v0, %v195_v6  ;;  %v794_v16 = vsel %vm2159_vm10, %v2157_v7, %v594_v4  ;;  %v2179_v19 = vsel %vm897_vm11, 1.0, %v2517_v2  ;;  %vm2181_vm3 = vcmp.eq.s32.totalorder %v992_v9, 1  ;;  %v1749_v0 = vld [vmem:[%s2507_s0 + $0x10] sm:$0x3f]  ;;  %v1759_v6 = vld [vmem:[%s2507_s0 + $0x20] sm:$0x3f] }
  0x1c   :  { %v1192_v22 = vrot.slane %v1091_v10, %v2023_v15  ;;  %vm1097_vm8 = vcmp.eq.s32.totalorder %v1996_v3, %v1096_v11  ;;  %v1291_v23 = vsel %vm2512_vm13, 1, %v1965_v20  ;;  %v1296_v24 = vrot.slane %v1288_v14, %v2023_v15 }
  0x1d   :  { %v197_v18 = vrot.slane %v196_v12, 1  ;;  %v994_v27 = vsel %vm2181_vm3, %v2179_v19, %v794_v16  ;;  %v2204_v29 = vsel %vm1097_vm8, 1.0, %v2517_v2  ;;  %v2536_v30 = vmov 0 }
  0x1e   :  { %vm2206_vm11 = vcmp.eq.s32.totalorder %v1192_v22, 1  ;;  %v1392_v31 = vrot.slane %v1291_v23, %v2023_v15  ;;  %vm1297_vm13 = vcmp.eq.s32.totalorder %v1996_v3, %v1296_v24  ;;  %v2539_v38 = vmov 0  ;;  %v1764_v22 = vld [vmem:[%s2507_s0 + $0x28] sm:$0x3f] }
  0x1f   :  { %v2193_v26 = vmax.f32 %v196_v12, %v197_v18  ;;  %v2537_v30 = vsel %vm2206_vm11, 4294967295, %v2536_v30  ;;  %v1194_v36 = vsel %vm2206_vm11, %v2204_v29, %v994_v27  ;;  %v2221_v37 = vsel %vm1297_vm13, 1.0, %v2517_v2 }
  0x20   :  { %2538 = vst [vmem:[#allocation8_spill] sm:$0xff] %v2537_v30  ;;  %vm2223_vm8 = vcmp.eq.s32.totalorder %v1392_v31, 1  ;;  %vm70_vm13 = vcmask 57344   ;;  %v2542_v54 = vmov 0 }
  0x21   :  { %v199_v28 = vsub.f32 %v2110_v52, %v2193_v26  ;;  %v2540_v38 = vsel %vm2223_vm8, 4294967295, %v2539_v38  ;;  %v1394_v39 = vsel %vm2223_vm8, %v2221_v37, %v1194_v36  ;;  %71 = vst.msk [vmem:[#allocation4] sm:$0x1] %vm70_vm13, %v2517_v2 }
  0x22   :  { %2541 = vst [vmem:[#allocation9_spill] sm:$0xff] %v2540_v38 }
  0x23   :  { %v200_v32 = vmul.f32 1.442695, %v199_v28 }
  0x25   :  { %1899 = vpow2.f32 %v200_v32 }
  0x2b   :  { %1898 = vset.pattern.permute.xlu0 %v1964_v8 }
  0x2f   :  { %v1900_v40 = vpop.eup %1899 }
  0x30   :  { %1817 = vmatpush3.msra.mxu1 %v1900_v40 }
  0x31   :  { %1826 = vmatprep.subr.mxu1 %v2517_v2 }
  0x82   :  { %v2091_v44 = vpop.trf.xlu0 }
  0x83   :  { %1814 = vmatmul.mubr.msk.f32.vlgmr.msra.gmra.mrb[0].mxu0 %vm51_vm1, %v2091_v44  ;;  %v52_v49 = vsel %vm51_vm1, %v2091_v44, -inf }
  0x84   :  { %53 = vmax.xlane.f32.xlu0 %v52_v49  ;;  %1822 = vmatpush3.msra.mxu0 %v191_v41  ;;  %v1484_v41 = vld [vmem:[%s2509_s2 + $0x7] sm:$0x1] }
  0x85   :  { %1823 = vmatprep.mubr.msk.f32.mxu0 %vm1962_vm0, %v2517_v2  ;;  %1831 = vmatprep.subr.mxu0 %v2517_v2  ;;  %vm1485_vm4 = vcmp.gt.s32.totalorder %v1484_v41, 0  ;;  %v2251_v49 = vld [vmem:[%s2508_s1 + $0x7] sm:$0x1] }
  0x86   :  { %v1486_v46 = vsel %vm1485_vm4, %v1484_v41, 0  ;;  %vm1490_vm5 = vcmp.ne.s32.totalorder %v2251_v49, 0  ;;  %vm2550_vm4 = vcmp.ne.s32.totalorder %v2089_v43, 0 }
  0x87   :  { %1824 = vmatmul.mubr.msk.f32.vlgmr.msra.gmra.mrb[2].mxu0 %vm51_vm1, %v2091_v44  ;;  %vm1487_vm12 = vcmp.lt.s32.totalorder %v1486_v46, 5  ;;  %v1491_v50 = vsel %vm1490_vm5, 1, %v1965_v20 }
  0x88   :  { %1832 = vmatpush3.msra.mxu0 %v394_v55  ;;  %1833 = vmatprep.mubr.msk.f32.mxu0 %vm1962_vm0, %v2517_v2  ;;  %v1488_v47 = vsel %vm1487_vm12, %v1486_v46, 5  ;;  %v1592_v51 = vrot.slane %v1491_v50, %v2023_v15 }
  0x89   :  { %1841 = vmatprep.subr.mxu0 %v2517_v2  ;;  %v1496_v48 = vrot.slane %v1488_v47, %v2023_v15 }
  0x8a   :  { %vm2262_vm12 = vcmp.eq.s32.totalorder %v1592_v51, 1 }
  0x8b   :  { %1834 = vmatmul.mubr.msk.f32.vlgmr.msra.gmra.mrb[4].mxu0 %vm51_vm1, %v2091_v44  ;;  %vm1497_vm14 = vcmp.eq.s32.totalorder %v1996_v3, %v1496_v48  ;;  %v2543_v54 = vsel %vm2262_vm12, 4294967295, %v2542_v54  ;;  %v1769_v48 = vld [vmem:[%s2507_s0 + $0x30] sm:$0x3f] }
  0x8c   :  { %1842 = vmatpush3.msra.mxu0 %v594_v4  ;;  %1843 = vmatprep.mubr.msk.f32.mxu0 %vm1962_vm0, %v2517_v2  ;;  %v2260_v53 = vsel %vm1497_vm14, 1.0, %v2517_v2  ;;  %2544 = vst [vmem:[#allocation10_spill] sm:$0xff] %v2543_v54  ;;  %vm76_vm14 = vcmask 1045504   ;;  %v1754_v4 = vld [vmem:[%s2507_s0 + $0x18] sm:$0x3f] }
  0x8d   :  { %1851 = vmatprep.subr.mxu0 %v2517_v2  ;;  %v2269_v55 = vsel %vm2262_vm12, %v2260_v53, %v1394_v39  ;;  %v2293_v62 = vsel %vm76_vm14, %v1744_v61, -10000.0  ;;  %v2310_v10 = vsel %vm76_vm14, %v1749_v0, -10000.0  ;;  %v2314_v12 = vsel %vm76_vm14, %v1754_v4, -10000.0 }
  0x8e   :  { %1683 = vst.msk [vmem:[#allocation3] sm:$0xff] %vm51_vm1, %v2269_v55  ;;  %v300_v1 = vmul.f32 %v2094_v45, %v2293_v62  ;;  %v2317_v14 = vsel %vm76_vm14, %v1759_v6, -10000.0  ;;  %v500_v18 = vmul.f32 %v2129_v58, %v2310_v10  ;;  %v700_v24 = vmul.f32 %v2157_v7, %v2314_v12 }
  0x8f   :  { %1844 = vmatmul.mubr.msk.f32.vlgmr.msra.gmra.mrb[6].mxu0 %vm51_vm1, %v2091_v44  ;;  %v2330_v32 = vsel %vm76_vm14, %v1764_v22, -10000.0 }
  0x90   :  { %1852 = vmatpush3.msra.mxu0 %v794_v16  ;;  %1853 = vmatprep.mubr.msk.f32.mxu0 %vm1962_vm0, %v2517_v2  ;;  %v301_v11 = vsel %vm51_vm1, %v300_v1, 0.0  ;;  %v501_v31 = vsel %vm51_vm1, %v500_v18, 0.0  ;;  %v1100_v46 = vmul.f32 %v2204_v29, %v2330_v32  ;;  %v2342_v1 = vsel %vm76_vm14, %v1769_v48, -10000.0 }
  0x91   :  { %1861 = vmatprep.subr.mxu0 %v2517_v2  ;;  %v302_v23 = vrot.slane %v301_v11, 4  ;;  %v502_v41 = vrot.slane %v501_v31, 4  ;;  %2545 = vst [vmem:[#allocation11_spill] sm:$0xff] %v2342_v1 }
  0x92   :  { %v1101_v0 = vsel %vm51_vm1, %v1100_v46, 0.0 }
  0x93   :  { %1854 = vmatmul.mubr.msk.f32.vlgmr.msra.gmra.mrb[8].mxu0 %vm51_vm1, %v2091_v44 }
  0x94   :  { %1862 = vmatpush3.msra.mxu0 %v994_v27  ;;  %1863 = vmatprep.mubr.msk.f32.mxu0 %vm1962_vm0, %v2517_v2  ;;  %v900_v27 = vmul.f32 %v2179_v19, %v2317_v14 }
  0x95   :  { %1871 = vmatprep.subr.mxu0 %v2517_v2 }
  0x96   :  { %v901_v40 = vsel %vm51_vm1, %v900_v27, 0.0  ;;  %v2355_v27 = vsel %vm290_vm9, 1.0, %v2517_v2  ;;  %vm2548_vm9 = vcmp.ne.s32.totalorder %v2061_v33, 0 }
  0x97   :  { %1864 = vmatmul.mubr.msk.f32.vlgmr.msra.gmra.mrb[10].mxu0 %vm51_vm1, %v2091_v44 }
  0x98   :  { %1872 = vmatpush3.msra.mxu0 %v1194_v36  ;;  %1873 = vmatprep.mubr.msk.f32.mxu0 %vm1962_vm0, %v2517_v2  ;;  %v303_v36 = vadd.f32 %v302_v23, %v301_v11 }
  0x99   :  { %1881 = vmatprep.subr.mxu0 %v2517_v2 }
  0x9a   :  { %v304_v61 = vrot.slane %v303_v36, 2 }
  0x9b   :  { %1874 = vmatmul.mubr.msk.f32.vlgmr.msra.gmra.mrb[12].mxu0 %vm51_vm1, %v2091_v44 }
  0x9c   :  { %1882 = vmatpush3.msra.mxu0 %v1394_v39  ;;  %1883 = vmatprep.mubr.msk.f32.mxu0 %vm1962_vm0, %v2517_v2  ;;  %v701_v39 = vsel %vm51_vm1, %v700_v24, 0.0  ;;  %v1774_v24 = vld [vmem:[%s2507_s0 + $0x38] sm:$0x3f]  ;;  %s1966_s0 = smov [#allocation5]  }
  0x9d   :  { %v702_v51 = vrot.slane %v701_v39, 4  ;;  %s1731_s9 = sshll.u32 %s1966_s0, 4  ;;  %s1732_s9 = int_to_ptr.vmem [resolvable:$true] %s1731_s9 }
  0x9e   :  { %s1937_s10 = scalar_lea.vmem %s1732_s9, 16  ;;  %s1941_s11 = scalar_lea.vmem %s1732_s9, 32 }
  0x9f   :  { %1884 = vmatmul.mubr.msk.f32.vlgmr.msra.gmra.mrb[14].mxu0 %vm51_vm1, %v2091_v44  ;;  %v703_v18 = vadd.f32 %v702_v51, %v701_v39  ;;  %v2371_v51 = vsel %vm2548_vm9, 1.0, %v2517_v2  ;;  %p1938_p0 = scmp.ne.s32.totalorder %s1732_s9, %s1937_s10  ;;  %p1942_p1 = scmp.lt.s32.totalorder %s1732_s9, %s1732_s9 }
  0xa0   :  { %p1943_p2 = scmp.lt.s32.totalorder %s1941_s11, %s1937_s10 }
  0xa2   :  { %p1944_p3 = por %p1943_p2, %p1942_p1 }
  0xa4   :  { %p1945_p4 = pnand %p1944_p3, %p1938_p0 }
 0x111   :  { %v2273_v3 = vpop.xlane.xlu0 %53 }
 0x112   :  { %v55_v15 = vsub.f32 %v2091_v44, %v2273_v3  ;;  %v2290_v44 = vsel %vm76_vm14, %v75_v60, -10000.0 }
 0x113   :  { %v94_v63 = vmul.f32 %v2064_v34, %v2290_v44 }
 0x114   :  { %v56_v20 = vmul.f32 1.442695, %v55_v15  ;;  %v902_v15 = vrot.slane %v901_v40, 4 }
 0x115   :  { %v95_v9 = vsel %vm51_vm1, %v94_v63, 0.0  ;;  %v503_v63 = vadd.f32 %v502_v41, %v501_v31  ;;  %v1300_v31 = vmul.f32 %v2221_v37, %v2342_v1  ;;  %v305_v41 = vadd.f32 %v304_v61, %v303_v36 }
 0x116   :  { %1901 = vpow2.f32 %v56_v20  ;;  %v96_v16 = vrot.slane %v95_v9, 4  ;;  %v903_v22 = vadd.f32 %v902_v15, %v901_v40  ;;  %v704_v36 = vrot.slane %v703_v18, 2 }
 0x117   :  { %v504_v39 = vrot.slane %v503_v63, 2  ;;  %v1301_v61 = vsel %vm51_vm1, %v1300_v31, 0.0 }
 0x118   :  { %v97_v28 = vadd.f32 %v96_v16, %v95_v9  ;;  %v1740_v16 = vsel %vm84_vm7, 1.0, %v2517_v2  ;;  %vm2546_vm7 = vcmp.ne.s32.totalorder %v2045_v25, 0  ;;  %v904_v15 = vrot.slane %v903_v22, 2 }
 0x119   :  { %v705_v30 = vadd.f32 %v704_v36, %v703_v18 }
 0x11a   :  { %v98_v47 = vrot.slane %v97_v28, 2 }
 0x11c   :  { %v99_v6 = vadd.f32 %v98_v47, %v97_v28  ;;  %v1102_v28 = vrot.slane %v1101_v0, 4 }
 0x11e   :  { %v100_v46 = vrot.slane %v99_v6, 1 }
 0x120   :  { %v2277_v57 = vpop.eup %1901  ;;  %v101_v33 = vadd.f32 %v100_v46, %v99_v6 }
 0x121   :  { %1819 = vmatmul.mubr.msk.f32.vlgmr.msra.gmra.mrb[0].mxu1 %vm51_vm1, %v2277_v57 }
 0x122   :  { %1828 = vmatprep.mubr.msk.f32.mxu1 %vm1962_vm0, %v2517_v2 }
 0x156   :  { %v171_v50 = vpop.f32.mrb[0].mxu0 }
 0x157   :  { %v175_v20 = vmul.f32 %v2064_v34, %v171_v50  ;;  %v1815_v60 = vpop.f32.mrb[1].mxu0  ;;  %v2366_v50 = vsel %vm76_vm14, %v1774_v24, -10000.0  ;;  %vm2551_vm14 = vcmp.ne.s32.totalorder %v2124_v56, 0 }
 0x158   :  { %2547 = vst [vmem:[#allocation12_spill] sm:$0xff] %v2366_v50  ;;  %v1103_v60 = vadd.f32 %v1102_v28, %v1101_v0  ;;  %v1500_v24 = vmul.f32 %v2260_v53, %v2366_v50  ;;  %v1302_v0 = vrot.slane %v1301_v61, 4  ;;  %v72_v50 = vld [vmem:[#allocation4] sm:$0x1] }
 0x159   :  { %v176_v4 = vsel %vm51_vm1, %v175_v20, 0.0 }
 0x15a   :  { %v177_v9 = vrot.slane %v176_v4, 4  ;;  %v374_v11 = vpop.f32.mrb[2].mxu0  ;;  %v1501_v46 = vsel %vm51_vm1, %v1500_v24, 0.0 }
 0x15b   :  { %v378_v34 = vmul.f32 %v2094_v45, %v374_v11  ;;  %v1825_v23 = vpop.f32.mrb[3].mxu0  ;;  %v2362_v45 = vsel %vm2546_vm7, 1.0, %v2517_v2  ;;  %v505_v11 = vadd.f32 %v504_v39, %v503_v63  ;;  %vm2552_vm7 = vcmp.ne.s32.totalorder %v2154_v5, 0 }
 0x15c   :  { %v178_v13 = vadd.f32 %v177_v9, %v176_v4 }
 0x15d   :  { %v379_v40 = vsel %vm51_vm1, %v378_v34, 0.0  ;;  %v306_v34 = vrot.slane %v305_v41, 1 }
 0x15e   :  { %v179_v47 = vrot.slane %v178_v13, 2  ;;  %v380_v48 = vrot.slane %v379_v40, 4  ;;  %v574_v17 = vpop.f32.mrb[4].mxu0 }
 0x15f   :  { %v578_v25 = vmul.f32 %v2129_v58, %v574_v17  ;;  %v1835_v20 = vpop.f32.mrb[5].mxu0  ;;  %v2378_v58 = vadd.f32 %v904_v15, %v903_v22  ;;  %v506_v17 = vrot.slane %v505_v11, 1 }
 0x160   :  { %v180_v4 = vadd.f32 %v179_v47, %v178_v13  ;;  %v381_v9 = vadd.f32 %v380_v48, %v379_v40  ;;  %v1104_v13 = vrot.slane %v1103_v60, 2  ;;  %v2381_v47 = vpop.permute.xlu1 %1690  ;;  %v307_v48 = vadd.f32 %v306_v34, %v305_v41 }
 0x161   :  { %v579_v23 = vsel %vm51_vm1, %v578_v25, 0.0  ;;  %v1303_v20 = vadd.f32 %v1302_v0, %v1301_v61 }
 0x162   :  { %v181_v2 = vrot.slane %v180_v4, 1  ;;  %v382_v54 = vrot.slane %v381_v9, 2  ;;  %v580_v38 = vrot.slane %v579_v23, 4  ;;  %v774_v1 = vpop.f32.mrb[6].mxu0  ;;  %v1105_v34 = vadd.f32 %v1104_v13, %v1103_v60 }
 0x163   :  { %v778_v28 = vmul.f32 %v2157_v7, %v774_v1  ;;  %v1845_v31 = vpop.f32.mrb[7].mxu0  ;;  %v706_v7 = vrot.slane %v705_v30, 1 }
 0x164   :  { %v182_v63 = vadd.f32 %v181_v2, %v180_v4  ;;  %v383_v39 = vadd.f32 %v382_v54, %v381_v9  ;;  %v581_v40 = vadd.f32 %v580_v38, %v579_v23  ;;  %v1693_v38 = vmul.f32 %v2381_v47, %v2269_v55 }
 0x165   :  { %v779_v6 = vsel %vm51_vm1, %v778_v28, 0.0  ;;  %v507_v23 = vadd.f32 %v506_v17, %v505_v11 }
 0x166   :  { %v183_v25 = vadd.f32 %v182_v63, %v101_v33  ;;  %v384_v18 = vrot.slane %v383_v39, 1  ;;  %v582_v22 = vrot.slane %v581_v40, 2  ;;  %v780_v36 = vrot.slane %v779_v6, 4  ;;  %v974_v15 = vpop.f32.mrb[8].mxu0 }
 0x167   :  { %v978_v1 = vmul.f32 %v2179_v19, %v974_v15  ;;  %v1855_v2 = vpop.f32.mrb[9].mxu0  ;;  %v1502_v33 = vrot.slane %v1501_v46, 4  ;;  %v1304_v19 = vrot.slane %v1303_v20, 2  ;;  %v707_v15 = vadd.f32 %v706_v7, %v705_v30 }
 0x168   :  { %v184_v54 = vmul.f32 %v1740_v16, %v183_v25  ;;  %v385_v41 = vadd.f32 %v384_v18, %v383_v39  ;;  %v583_v4 = vadd.f32 %v582_v22, %v581_v40  ;;  %v781_v9 = vadd.f32 %v780_v36, %v779_v6 }
 0x169   :  { %v979_v24 = vsel %vm51_vm1, %v978_v1, 0.0  ;;  %v1694_v16 = vsel %vm51_vm1, %v1693_v38, 0.0  ;;  %v906_v40 = vrot.slane %v2378_v58, 1  ;;  %v1503_v17 = vadd.f32 %v1502_v33, %v1501_v46 }
 0x16a   :  { %v386_v28 = vadd.f32 %v385_v41, %v307_v48  ;;  %v584_v31 = vrot.slane %v583_v4, 1  ;;  %v782_v63 = vrot.slane %v781_v9, 2  ;;  %v980_v61 = vrot.slane %v979_v24, 4  ;;  %v1174_v0 = vpop.f32.mrb[10].mxu0 }
 0x16b   :  { %v1178_v2 = vmul.f32 %v2204_v29, %v1174_v0  ;;  %v1865_v55 = vpop.f32.mrb[11].mxu0  ;;  %v185_v6 = vadd.f32 %v184_v54, %v72_v50  ;;  %v1305_v29 = vadd.f32 %v1304_v19, %v1303_v20  ;;  %v1695_v38 = vrot.slane %v1694_v16, 4 }
 0x16c   :  { %v387_v39 = vmul.f32 %v2355_v27, %v386_v28  ;;  %v585_v60 = vadd.f32 %v584_v31, %v583_v4  ;;  %v783_v11 = vadd.f32 %v782_v63, %v781_v9  ;;  %v981_v13 = vadd.f32 %v980_v61, %v979_v24 }
 0x16d   :  { %v1179_v48 = vsel %vm51_vm1, %v1178_v2, 0.0  ;;  %v907_v28 = vadd.f32 %v906_v40, %v2378_v58  ;;  %v1106_v46 = vrot.slane %v1105_v34, 1  ;;  %v1504_v54 = vrot.slane %v1503_v17, 2 }
 0x16e   :  { %v586_v25 = vadd.f32 %v585_v60, %v507_v23  ;;  %v784_v18 = vrot.slane %v783_v11, 1  ;;  %v982_v22 = vrot.slane %v981_v13, 2  ;;  %v1180_v30 = vrot.slane %v1179_v48, 4  ;;  %v1374_v36 = vpop.f32.mrb[12].mxu0 }
 0x16f   :  { %v1378_v7 = vmul.f32 %v2221_v37, %v1374_v36  ;;  %v1875_v1 = vpop.f32.mrb[13].mxu0  ;;  %v388_v27 = vadd.f32 %v387_v39, %v185_v6  ;;  %v2549_v37 = vmov 0.0   ;;  %v1696_v19 = vadd.f32 %v1695_v38, %v1694_v16 }
 0x170   :  { %v587_v41 = vmul.f32 %v2362_v45, %v586_v25  ;;  %v785_v4 = vadd.f32 %v784_v18, %v783_v11  ;;  %v983_v9 = vadd.f32 %v982_v22, %v981_v13  ;;  %v1181_v24 = vadd.f32 %v1180_v30, %v1179_v48 }
 0x171   :  { %v1379_v50 = vsel %vm51_vm1, %v1378_v7, 0.0  ;;  %v1760_v61 = vsel %vm2550_vm4, 1.0, %v2549_v37  ;;  %v1107_v11 = vadd.f32 %v1106_v46, %v1105_v34  ;;  %v1505_v13 = vadd.f32 %v1504_v54, %v1503_v17 }
 0x172   :  { %v786_v23 = vadd.f32 %v785_v4, %v707_v15  ;;  %v984_v33 = vrot.slane %v983_v9, 1  ;;  %v1182_v31 = vrot.slane %v1181_v24, 2  ;;  %v1380_v20 = vrot.slane %v1379_v50, 4  ;;  %v1574_v63 = vpop.f32.mrb[14].mxu0 }
 0x173   :  { %v1578_v45 = vmul.f32 %v2260_v53, %v1574_v63  ;;  %v1885_v0 = vpop.f32.mrb[15].mxu0  ;;  %v588_v2 = vadd.f32 %v587_v41, %v388_v27  ;;  %v1306_v15 = vrot.slane %v1305_v29, 1  ;;  %v1697_v18 = vrot.slane %v1696_v19, 2 }
 0x174   :  { %v787_v58 = vmul.f32 %v2371_v51, %v786_v23  ;;  %v985_v55 = vadd.f32 %v984_v33, %v983_v9  ;;  %v1183_v39 = vadd.f32 %v1182_v31, %v1181_v24  ;;  %v1381_v60 = vadd.f32 %v1380_v20, %v1379_v50 }
 0x175   :  { %v1579_v40 = vsel %vm51_vm1, %v1578_v45, 0.0  ;;  %v1765_v51 = vsel %vm2551_vm14, 1.0, %v2549_v37  ;;  %v1307_v7 = vadd.f32 %v1306_v15, %v1305_v29  ;;  %v1506_v34 = vrot.slane %v1505_v13, 1 }
 0x176   :  { %v986_v48 = vadd.f32 %v985_v55, %v907_v28  ;;  %v1184_v6 = vrot.slane %v1183_v39, 1  ;;  %v1382_v25 = vrot.slane %v1381_v60, 2  ;;  %v1580_v43 = vrot.slane %v1579_v40, 4 }
 0x177   :  { %v788_v22 = vadd.f32 %v787_v58, %v588_v2  ;;  %v1698_v24 = vadd.f32 %v1697_v18, %v1696_v19  ;;  %v1770_v28 = vsel %vm2552_vm7, 1.0, %v2549_v37  ;;  %v1507_v50 = vadd.f32 %v1506_v34, %v1505_v13 }
 0x178   :  { %v987_v53 = vmul.f32 %v1760_v61, %v986_v48  ;;  %v1185_v30 = vadd.f32 %v1184_v6, %v1183_v39  ;;  %v1383_v16 = vadd.f32 %v1382_v25, %v1381_v60  ;;  %v1581_v36 = vadd.f32 %v1580_v43, %v1579_v40 }
 0x179   :  { %v1699_v29 = vrot.slane %v1698_v24, 1  ;;  %v1775_v31 = vsel %vm1490_vm5, 1.0, %v2549_v37  ;;  %v275_v55 = vadd.f32 %v2193_v26, %v2273_v3 }
 0x17a   :  { %v1186_v1 = vadd.f32 %v1185_v30, %v1107_v11  ;;  %v1384_v17 = vrot.slane %v1383_v16, 1  ;;  %v1582_v38 = vrot.slane %v1581_v36, 2  ;;  %v988_v27 = vadd.f32 %v987_v53, %v788_v22 }
 0x17b   :  { %v1700_v45 = vadd.f32 %v1699_v29, %v1698_v24 }
 0x17c   :  { %v1187_v41 = vmul.f32 %v1765_v51, %v1186_v1  ;;  %v1385_v4 = vadd.f32 %v1384_v17, %v1383_v16  ;;  %v1583_v9 = vadd.f32 %v1582_v38, %v1581_v36 }
 0x17e   :  { %v1386_v46 = vadd.f32 %v1385_v4, %v1307_v7  ;;  %v1584_v54 = vrot.slane %v1583_v9, 1  ;;  %v1188_v23 = vadd.f32 %v1187_v41, %v988_v27 }
 0x180   :  { %v1387_v56 = vmul.f32 %v1770_v28, %v1386_v46  ;;  %v1585_v33 = vadd.f32 %v1584_v54, %v1583_v9 }
 0x182   :  { %v1586_v20 = vadd.f32 %v1585_v33, %v1507_v50  ;;  %v1388_v63 = vadd.f32 %v1387_v56, %v1188_v23 }
 0x184   :  { %v1587_v61 = vmul.f32 %v1775_v31, %v1586_v20 }
 0x186   :  { %v1588_v0 = vadd.f32 %v1587_v61, %v1388_v63 }
 0x188   :  { %1682 = vst.msk [vmem:[#allocation4] sm:$0x1] %vm70_vm13, %v1588_v0  ;;  %v2414_v5 = vadd.f32 %v1700_v45, %v1588_v0 }
 0x1f4   :  { %v271_v19 = vpop.f32.mrb[0].mxu1 }
 0x1f5   :  { %1903 = vlog2.f32 %v271_v19  ;;  %v1820_v2 = vpop.f32.mrb[1].mxu1 }
 0x1ff   :  { %v1904_v58 = vpop.eup %1903 }
 0x200   :  { %v277_v39 = vmul.f32 0.6931472, %v1904_v58 }
 0x202   :  { %v278_v60 = vadd.f32 %v277_v39, %v275_v55 }
 0x204   :  { %v279_v49 = vadd.f32 %v278_v60, %v2290_v44 }
 0x206   :  { %v280_v11 = vsel %vm2066_vm2, %v279_v49, %v2110_v52 }
 0x207   :  { %v395_v15 = vsel %vm51_vm1, %v280_v11, -inf }
 0x208   :  { %v396_v13 = vrot.slane %v395_v15, 4 }
 0x20a   :  { %v397_v40 = vmax.f32 %v395_v15, %v396_v13 }
 0x20c   :  { %v398_v48 = vrot.slane %v397_v40, 2 }
 0x20e   :  { %v399_v6 = vmax.f32 %v397_v40, %v398_v48 }
 0x210   :  { %v400_v25 = vrot.slane %v399_v6, 1 }
 0x212   :  { %v401_v43 = vmax.f32 %v399_v6, %v400_v25 }
 0x214   :  { %v402_v18 = vsub.f32 %v280_v11, %v401_v43  ;;  %v475_v53 = vadd.f32 %v401_v43, %v2273_v3 }
 0x216   :  { %v403_v22 = vmul.f32 1.442695, %v402_v18 }
 0x218   :  { %1905 = vpow2.f32 %v403_v22 }
 0x222   :  { %v1906_v26 = vpop.eup %1905 }
 0x223   :  { %1827 = vmatpush3.msra.mxu1 %v1906_v26 }
 0x224   :  { %1829 = vmatmul.mubr.msk.f32.vlgmr.msra.gmra.mrb[2].mxu1 %vm51_vm1, %v2277_v57  ;;  %1836 = vmatprep.subr.mxu1 %v2549_v37 }
 0x225   :  { %1838 = vmatprep.mubr.msk.f32.mxu1 %vm1962_vm0, %v2549_v37 }
 0x2f7   :  { %v471_v35 = vpop.f32.mrb[2].mxu1 }
 0x2f8   :  { %1907 = vlog2.f32 %v471_v35  ;;  %v1830_v52 = vpop.f32.mrb[3].mxu1 }
 0x302   :  { %v1908_v44 = vpop.eup %1907 }
 0x303   :  { %v477_v30 = vmul.f32 0.6931472, %v1908_v44 }
 0x305   :  { %v478_v16 = vadd.f32 %v477_v30, %v475_v53 }
 0x307   :  { %v479_v36 = vadd.f32 %v478_v16, %v2293_v62 }
 0x309   :  { %v480_v51 = vsel %vm2082_vm6, %v479_v36, %v280_v11 }
 0x30a   :  { %v595_v7 = vsel %vm51_vm1, %v480_v51, -inf }
 0x30b   :  { %v596_v34 = vrot.slane %v595_v7, 4 }
 0x30d   :  { %v597_v1 = vmax.f32 %v595_v7, %v596_v34 }
 0x30f   :  { %v598_v17 = vrot.slane %v597_v1, 2 }
 0x311   :  { %v599_v38 = vmax.f32 %v597_v1, %v598_v17 }
 0x313   :  { %v600_v27 = vrot.slane %v599_v38, 1 }
 0x315   :  { %v601_v41 = vmax.f32 %v599_v38, %v600_v27 }
 0x317   :  { %v602_v4 = vsub.f32 %v480_v51, %v601_v41  ;;  %v675_v46 = vadd.f32 %v601_v41, %v2273_v3 }
 0x319   :  { %v603_v9 = vmul.f32 1.442695, %v602_v4 }
 0x31b   :  { %1909 = vpow2.f32 %v603_v9 }
 0x325   :  { %v1910_v24 = vpop.eup %1909 }
 0x326   :  { %1837 = vmatpush3.msra.mxu1 %v1910_v24 }
 0x327   :  { %1839 = vmatmul.mubr.msk.f32.vlgmr.msra.gmra.mrb[4].mxu1 %vm51_vm1, %v2277_v57  ;;  %1846 = vmatprep.subr.mxu1 %v2549_v37 }
 0x328   :  { %1848 = vmatprep.mubr.msk.f32.mxu1 %vm1962_vm0, %v2549_v37 }
 0x3fa   :  { %v671_v42 = vpop.f32.mrb[4].mxu1 }
 0x3fb   :  { %1911 = vlog2.f32 %v671_v42  ;;  %v1840_v62 = vpop.f32.mrb[5].mxu1 }
 0x405   :  { %v1912_v28 = vpop.eup %1911 }
 0x406   :  { %v677_v50 = vmul.f32 0.6931472, %v1912_v28 }
 0x408   :  { %v678_v54 = vadd.f32 %v677_v50, %v675_v46 }
 0x40a   :  { %v679_v23 = vadd.f32 %v678_v54, %v2310_v10 }
 0x40c   :  { %v680_v56 = vsel %vm2131_vm15, %v679_v23, %v480_v51 }
 0x40d   :  { %v795_v33 = vsel %vm51_vm1, %v680_v56, -inf }
 0x40e   :  { %v796_v29 = vrot.slane %v795_v33, 4 }
 0x410   :  { %v797_v31 = vmax.f32 %v795_v33, %v796_v29 }
 0x412   :  { %v798_v20 = vrot.slane %v797_v31, 2 }
 0x414   :  { %v799_v63 = vmax.f32 %v797_v31, %v798_v20 }
 0x416   :  { %v800_v61 = vrot.slane %v799_v63, 1 }
 0x418   :  { %v801_v45 = vmax.f32 %v799_v63, %v800_v61 }
 0x41a   :  { %v802_v0 = vsub.f32 %v680_v56, %v801_v45  ;;  %v875_v55 = vadd.f32 %v801_v45, %v2273_v3 }
 0x41c   :  { %v803_v19 = vmul.f32 1.442695, %v802_v0 }
 0x41e   :  { %1913 = vpow2.f32 %v803_v19 }
 0x428   :  { %v1914_v2 = vpop.eup %1913 }
 0x429   :  { %1847 = vmatpush3.msra.mxu1 %v1914_v2 }
 0x42a   :  { %1849 = vmatmul.mubr.msk.f32.vlgmr.msra.gmra.mrb[6].mxu1 %vm51_vm1, %v2277_v57  ;;  %1856 = vmatprep.subr.mxu1 %v2549_v37 }
 0x42b   :  { %1858 = vmatprep.mubr.msk.f32.mxu1 %vm1962_vm0, %v2549_v37 }
 0x4fd   :  { %v871_v59 = vpop.f32.mrb[6].mxu1 }
 0x4fe   :  { %1915 = vlog2.f32 %v871_v59  ;;  %v1850_v10 = vpop.f32.mrb[7].mxu1 }
 0x508   :  { %v1916_v58 = vpop.eup %1915 }
 0x509   :  { %v877_v39 = vmul.f32 0.6931472, %v1916_v58  ;;  %v2554_v58 = vld [vmem:[#allocation11_spill] sm:$0xff] }
 0x50b   :  { %v878_v60 = vadd.f32 %v877_v39, %v875_v55 }
 0x50d   :  { %v879_v49 = vadd.f32 %v878_v60, %v2314_v12 }
 0x50f   :  { %v880_v11 = vsel %vm2159_vm10, %v879_v49, %v680_v56 }
 0x510   :  { %v995_v15 = vsel %vm51_vm1, %v880_v11, -inf }
 0x511   :  { %v996_v13 = vrot.slane %v995_v15, 4 }
 0x513   :  { %v997_v40 = vmax.f32 %v995_v15, %v996_v13 }
 0x515   :  { %v998_v48 = vrot.slane %v997_v40, 2 }
 0x517   :  { %v999_v6 = vmax.f32 %v997_v40, %v998_v48 }
 0x519   :  { %v1000_v25 = vrot.slane %v999_v6, 1 }
 0x51b   :  { %v1001_v43 = vmax.f32 %v999_v6, %v1000_v25 }
 0x51d   :  { %v1002_v18 = vsub.f32 %v880_v11, %v1001_v43  ;;  %v1075_v52 = vadd.f32 %v1001_v43, %v2273_v3 }
 0x51f   :  { %v1003_v22 = vmul.f32 1.442695, %v1002_v18 }
 0x521   :  { %1917 = vpow2.f32 %v1003_v22 }
 0x52b   :  { %v1918_v26 = vpop.eup %1917 }
 0x52c   :  { %1857 = vmatpush3.msra.mxu1 %v1918_v26 }
 0x52d   :  { %1859 = vmatmul.mubr.msk.f32.vlgmr.msra.gmra.mrb[8].mxu1 %vm51_vm1, %v2277_v57  ;;  %1866 = vmatprep.subr.mxu1 %v2549_v37 }
 0x52e   :  { %1868 = vmatprep.mubr.msk.f32.mxu1 %vm1962_vm0, %v2549_v37 }
 0x600   :  { %v1071_v8 = vpop.f32.mrb[8].mxu1 }
 0x601   :  { %1919 = vlog2.f32 %v1071_v8  ;;  %v1860_v12 = vpop.f32.mrb[9].mxu1 }
 0x60b   :  { %v1920_v35 = vpop.eup %1919 }
 0x60c   :  { %v1077_v44 = vmul.f32 0.6931472, %v1920_v35 }
 0x60e   :  { %v1078_v53 = vadd.f32 %v1077_v44, %v1075_v52  ;;  %v2556_v52 = vld [vmem:[#allocation12_spill] sm:$0xff] }
 0x610   :  { %v1079_v30 = vadd.f32 %v1078_v53, %v2317_v14 }
 0x612   :  { %v1080_v16 = vsel %vm2181_vm3, %v1079_v30, %v880_v11 }
 0x613   :  { %v1195_v36 = vsel %vm51_vm1, %v1080_v16, -inf }
 0x614   :  { %v1196_v51 = vrot.slane %v1195_v36, 4 }
 0x616   :  { %v1197_v7 = vmax.f32 %v1195_v36, %v1196_v51 }
 0x618   :  { %v1198_v34 = vrot.slane %v1197_v7, 2 }
 0x61a   :  { %v1199_v1 = vmax.f32 %v1197_v7, %v1198_v34 }
 0x61c   :  { %v1200_v17 = vrot.slane %v1199_v1, 1 }
 0x61e   :  { %v1201_v38 = vmax.f32 %v1199_v1, %v1200_v17 }
 0x620   :  { %v1202_v27 = vsub.f32 %v1080_v16, %v1201_v38  ;;  %v1275_v24 = vadd.f32 %v1201_v38, %v2273_v3 }
 0x622   :  { %v1203_v41 = vmul.f32 1.442695, %v1202_v27 }
 0x624   :  { %1921 = vpow2.f32 %v1203_v41 }
 0x62e   :  { %v1922_v4 = vpop.eup %1921 }
 0x62f   :  { %1867 = vmatpush3.msra.mxu1 %v1922_v4 }
 0x630   :  { %1869 = vmatmul.mubr.msk.f32.vlgmr.msra.gmra.mrb[10].mxu1 %vm51_vm1, %v2277_v57  ;;  %1876 = vmatprep.subr.mxu1 %v2549_v37 }
 0x631   :  { %1878 = vmatprep.mubr.msk.f32.mxu1 %vm1962_vm0, %v2549_v37 }
 0x703   :  { %v1271_v21 = vpop.f32.mrb[10].mxu1 }
 0x704   :  { %1923 = vlog2.f32 %v1271_v21  ;;  %v1870_v14 = vpop.f32.mrb[11].mxu1 }
 0x70e   :  { %v1924_v9 = vpop.eup %1923 }
 0x70f   :  { %v1277_v42 = vmul.f32 0.6931472, %v1924_v9 }
 0x711   :  { %v1278_v62 = vadd.f32 %v1277_v42, %v1275_v24 }
 0x713   :  { %v1279_v28 = vadd.f32 %v1278_v62, %v2330_v32 }
 0x715   :  { %v1280_v50 = vsel %vm2206_vm11, %v1279_v28, %v1080_v16 }
 0x716   :  { %v1395_v54 = vsel %vm51_vm1, %v1280_v50, -inf }
 0x717   :  { %v1396_v23 = vrot.slane %v1395_v54, 4 }
 0x719   :  { %v1397_v56 = vmax.f32 %v1395_v54, %v1396_v23 }
 0x71b   :  { %v1398_v33 = vrot.slane %v1397_v56, 2 }
 0x71d   :  { %v1399_v29 = vmax.f32 %v1397_v56, %v1398_v33 }
 0x71f   :  { %v1400_v31 = vrot.slane %v1399_v29, 1 }
 0x721   :  { %v1401_v20 = vmax.f32 %v1399_v29, %v1400_v31 }
 0x723   :  { %v1402_v63 = vsub.f32 %v1280_v50, %v1401_v20  ;;  %v1475_v2 = vadd.f32 %v1401_v20, %v2273_v3 }
 0x725   :  { %v1403_v61 = vmul.f32 1.442695, %v1402_v63 }
 0x727   :  { %1925 = vpow2.f32 %v1403_v61 }
 0x731   :  { %v1926_v45 = vpop.eup %1925 }
 0x732   :  { %1877 = vmatpush3.msra.mxu1 %v1926_v45 }
 0x733   :  { %1879 = vmatmul.mubr.msk.f32.vlgmr.msra.gmra.mrb[12].mxu1 %vm51_vm1, %v2277_v57  ;;  %1886 = vmatprep.subr.mxu1 %v2549_v37 }
 0x734   :  { %1888 = vmatprep.mubr.msk.f32.mxu1 %vm1962_vm0, %v2549_v37 }
 0x806   :  { %v1471_v32 = vpop.f32.mrb[12].mxu1 }
 0x807   :  { %1927 = vlog2.f32 %v1471_v32  ;;  %v1880_v0 = vpop.f32.mrb[13].mxu1 }
 0x811   :  { %v1928_v19 = vpop.eup %1927 }
 0x812   :  { %v1477_v59 = vmul.f32 0.6931472, %v1928_v19 }
 0x814   :  { %v1478_v10 = vadd.f32 %v1477_v59, %v1475_v2 }
 0x816   :  { %v1479_v55 = vadd.f32 %v1478_v10, %v2554_v58 }
 0x818   :  { %v1480_v60 = vsel %vm2223_vm8, %v1479_v55, %v1280_v50 }
 0x819   :  { %v1595_v49 = vsel %vm51_vm1, %v1480_v60, -inf }
 0x81a   :  { %v1596_v11 = vrot.slane %v1595_v49, 4 }
 0x81c   :  { %v1597_v15 = vmax.f32 %v1595_v49, %v1596_v11 }
 0x81e   :  { %v1598_v13 = vrot.slane %v1597_v15, 2 }
 0x820   :  { %v1599_v40 = vmax.f32 %v1597_v15, %v1598_v13 }
 0x822   :  { %v1600_v37 = vrot.slane %v1599_v40, 1 }
 0x824   :  { %v1601_v48 = vmax.f32 %v1599_v40, %v1600_v37 }
 0x826   :  { %v1602_v6 = vsub.f32 %v1480_v60, %v1601_v48  ;;  %v1675_v8 = vadd.f32 %v1601_v48, %v2273_v3 }
 0x828   :  { %v1603_v25 = vmul.f32 1.442695, %v1602_v6 }
 0x82a   :  { %1929 = vpow2.f32 %v1603_v25 }
 0x834   :  { %v1930_v43 = vpop.eup %1929 }
 0x835   :  { %1887 = vmatpush3.msra.mxu1 %v1930_v43 }
 0x836   :  { %1889 = vmatmul.mubr.msk.f32.vlgmr.msra.gmra.mrb[14].mxu1 %vm51_vm1, %v2277_v57 }
 0x909   :  { %v1671_v18 = vpop.f32.mrb[14].mxu1 }
 0x90a   :  { %1931 = vlog2.f32 %v1671_v18  ;;  %v1890_v22 = vpop.f32.mrb[15].mxu1 }
 0x914   :  { %v1932_v26 = vpop.eup %1931 }
 0x915   :  { %v1677_v12 = vmul.f32 0.6931472, %v1932_v26 }
 0x917   :  { %v1678_v35 = vadd.f32 %v1677_v12, %v1675_v8 }
 0x919   :  { %v1679_v44 = vadd.f32 %v1678_v35, %v2556_v52 }
 0x91b   :  { %v1680_v30 = vsel %vm2262_vm12, %v1679_v44, %v1480_v60 }
 0x91c   :  { %1684 = vst.msk [vmem:[#allocation2] sm:$0xff] %vm51_vm1, %v1680_v30  ;;  %v1702_v16 = vadd.f32 %v2381_v47, %v1680_v30 }
 0x91e   :  { %v1703_v36 = vsel %vm51_vm1, %v1702_v16, -inf }
 0x91f   :  { %v1704_v57 = vrot.slane %v1703_v36, 4 }
 0x921   :  { %v1705_v51 = vmax.f32 %v1703_v36, %v1704_v57 }
 0x923   :  { %v1706_v7 = vrot.slane %v1705_v51, 2 }
 0x925   :  { %v1707_v34 = vmax.f32 %v1705_v51, %v1706_v7 }
 0x927   :  { %v1708_v1 = vrot.slane %v1707_v34, 1 }
 0x929   :  { %v1709_v17 = vmax.f32 %v1707_v34, %v1708_v1 }
 0x92b   :  { %v1710_v3 = vsub.f32 %v1702_v16, %v1709_v17 }
 0x92d   :  { %v1711_v38 = vmul.f32 1.442695, %v1710_v3 }
 0x92f   :  { %1933 = vpow2.f32 %v1711_v38 }
 0x939   :  { %v1934_v27 = vpop.eup %1933 }
 0x93a   :  { %v1713_v41 = vsel %vm51_vm1, %v1934_v27, 0.0 }
 0x93b   :  { %v1714_v4 = vrot.slane %v1713_v41, 4 }
 0x93d   :  { %v1715_v21 = vadd.f32 %v1714_v4, %v1713_v41 }
 0x93f   :  { %v1716_v14 = vrot.slane %v1715_v21, 2 }
 0x941   :  { %v1717_v9 = vadd.f32 %v1716_v14, %v1715_v21 }
 0x943   :  { %v1718_v24 = vrot.slane %v1717_v9, 1 }
 0x945   :  { %v1719_v47 = vadd.f32 %v1718_v24, %v1717_v9 }
 0x947   :  { %1935 = vlog2.f32 %v1719_v47 }
 0x951   :  { %v1936_v42 = vpop.eup %1935 }
 0x952   :  { %v1721_v62 = vmul.f32 0.6931472, %v1936_v42 }
 0x954   :  { %v1722_v28 = vadd.f32 %v1721_v62, %v1709_v17 }
 0x956   :  { %v1723_v46 = vsub.f32 %v2414_v5, %v1722_v28 }
 0x958   :  { %1724 = vst.msk [vmem:[#allocation5] sm:$0x1] %vm70_vm13, %v1723_v46 }
 0x959   :  { %1948 = shalt.err (!%p1945_p4)
}
 0x95a   :  { %s1949_s14 = scalar_lea.hbm %s2511_s4, 16 }
 0x95b   :  { %p1950_p5 = scmp.ne.s32.totalorder %s2511_s4, %s1949_s14  ;;  %p1953_p6 = scmp.lt.u32.totalorder %s1949_s14, %s2511_s4 }
 0x95d   :  { %p1955_p7 = pnand %p1953_p6, %p1950_p5 }
 0x95f   :  { %1958 = shalt.err (!%p1955_p7)
}
 0x960   :  { %1734 = dma.vmem_to_hbm [thread:$0]  %s1732_s9, 16, %s2511_s4, [#allocation6]  }
 0x961   :  { %1959 = dma.done.wait [#allocation6], 16  }
 0x962   :  { %1960 = vsyncadd [#allocation6], 4294967280 }
 0x963   :  { %1738 = vsyncpa [#allocation6], 1 }

</bundles_post_ra>
